<compile_context>
chip_gen: v7x
topology: tpu7x:2x2x1
jax: 0.10.0
libtpu: 0.0.40
codegen_flags: <defaults>
</compile_context>

<pallas_src>
import functools

import jax
import jax.numpy as jnp
from jax.experimental import pallas as pl
from jax.experimental.pallas import tpu as pltpu


_VMEM_LIMIT_BYTES = 64 * 1024 * 1024   # raise scoped VMEM (v5e default is 16 MiB)
_FUSE_MAX_ROWS = 1024                  # whole-graph-in-VMEM fused path below this


# ----------------------------------------------------------------------------
# Helpers
# ----------------------------------------------------------------------------
def _round_up(x: int, m: int) -> int:
    return (x + m - 1) // m * m


def _row_tiling(n: int):
    """(n_pad, tm): rows padded to a multiple of 32 (int8 sublane tile) and a
    row-tile that divides it; >=2 row blocks when possible (v7x megacore)."""
    n_pad = _round_up(n, 32)
    if n_pad <= 32:
        return n_pad, n_pad
    if n_pad <= 512:
        tm = _round_up(n_pad // 2, 32)
        return _round_up(n_pad, tm), tm
    tm = 256 if n_pad <= 8192 else 128   # cap tm so VMEM stays bounded at large N
    return _round_up(n_pad, tm), tm


def _pad2(x, rows: int, cols: int):
    return jnp.pad(x, ((0, rows - x.shape[0]), (0, cols - x.shape[1])))


# ----------------------------------------------------------------------------
# Fused small-graph kernel: all GNN layers/passes + MLP head in one call.
# ----------------------------------------------------------------------------
def _fused_gnn_kernel(adj_ref, y_ref, xw_ref, *rest,
                      n_gnn_layers, n_u_layers, n_pass, n_mlp_hidden):
    out_ref = rest[-1]
    wr = rest[:-1]
    per_layer = 3 + 2 * (n_u_layers - 1)

    # int8 adjacency -> bf16 once (VPU cast); MXU consumes bf16 on all chips.
    adj = adj_ref[...].astype(jnp.float32).astype(jnp.bfloat16)
    y = y_ref[...]                                         # bf16 activations

    for li in range(n_gnn_layers):
        base = li * per_layer
        for _ in range(n_pass):
            # message aggregation: m = A @ y   (bf16 MXU, f32 acc)
            m = jnp.dot(adj, y, preferred_element_type=jnp.float32)
            # first U layer, concat-free: h = y@W_y + m@W_m + b
            h = (jnp.dot(y, wr[base][...], preferred_element_type=jnp.float32)
                 + jnp.dot(m.astype(jnp.bfloat16), wr[base + 1][...],
                           preferred_element_type=jnp.float32)
                 + wr[base + 2][...])
            for ui in range(n_u_layers - 1):
                h = jnp.maximum(h, 0.0)
                h = (jnp.dot(h.astype(jnp.bfloat16), wr[base + 3 + 2 * ui][...],
                             preferred_element_type=jnp.float32)
                     + wr[base + 4 + 2 * ui][...])
            y = h.astype(jnp.bfloat16)

    # MLP head: cat([y, X, W]) folded into split-weight matmuls.
    hb = n_gnn_layers * per_layer
    h = (jnp.dot(y, wr[hb][...], preferred_element_type=jnp.float32)
         + jnp.dot(xw_ref[...], wr[hb + 1][...], preferred_element_type=jnp.float32)
         + wr[hb + 2][...])
    for li in range(n_mlp_hidden):
        h = jnp.maximum(h, 0.0)
        h = (jnp.dot(h.astype(jnp.bfloat16), wr[hb + 3 + 2 * li][...],
                     preferred_element_type=jnp.float32)
             + wr[hb + 4 + 2 * li][...])
    out_ref[...] = h


def fused_gnn(adj, y0, xw, gnn_flats, head_flat, *, n_pass, n_u_layers,
              n_mlp_hidden, dim_out_pad):
    n_pad = y0.shape[0]
    all_flat = [w for flat in gnn_flats for w in flat] + list(head_flat)
    in_specs = ([pl.BlockSpec(adj.shape, lambda i: (0, 0)),
                 pl.BlockSpec(y0.shape, lambda i: (0, 0)),
                 pl.BlockSpec(xw.shape, lambda i: (0, 0))]
                + [pl.BlockSpec(w.shape, lambda i: (0, 0)) for w in all_flat])
    return pl.pallas_call(
        functools.partial(_fused_gnn_kernel, n_gnn_layers=len(gnn_flats),
                          n_u_layers=n_u_layers, n_pass=n_pass,
                          n_mlp_hidden=n_mlp_hidden),
        out_shape=jax.ShapeDtypeStruct((n_pad, dim_out_pad), jnp.float32),
        grid=(1,),
        in_specs=in_specs,
        out_specs=pl.BlockSpec((n_pad, dim_out_pad), lambda i: (0, 0)),
        compiler_params=pltpu.CompilerParams(
            dimension_semantics=("arbitrary",),
            vmem_limit_bytes=_VMEM_LIMIT_BYTES),
    )(adj, y0, xw, *all_flat)


# ----------------------------------------------------------------------------
# Row-tiled large-graph path: one fused pallas_call per message pass.
# ----------------------------------------------------------------------------
def _gnn_pass_kernel(adj_ref, yfull_ref, *rest, n_u_layers, tm):
    out_ref = rest[-1]
    wr = rest[:-1]                       # w_y, w_m, b0, (w_i, b_i)*

    adj = adj_ref[...].astype(jnp.float32).astype(jnp.bfloat16)   # int8 -> bf16
    m = jnp.dot(adj, yfull_ref[...], preferred_element_type=jnp.float32)

    # self rows sliced from the already-resident full-y block (no extra stream)
    row0 = pl.multiple_of(pl.program_id(0) * tm, 32)
    yblk = yfull_ref[pl.ds(row0, tm), :]

    h = (jnp.dot(yblk, wr[0][...], preferred_element_type=jnp.float32)
         + jnp.dot(m.astype(jnp.bfloat16), wr[1][...],
                   preferred_element_type=jnp.float32)
         + wr[2][...])
    for ui in range(n_u_layers - 1):
        h = jnp.maximum(h, 0.0)
        h = (jnp.dot(h.astype(jnp.bfloat16), wr[3 + 2 * ui][...],
                     preferred_element_type=jnp.float32)
             + wr[4 + 2 * ui][...])
    out_ref[...] = h.astype(out_ref.dtype)          # bf16, 128-lane dense


def gnn_layer_pass(adj, y, flat, *, tm, n_u_layers):
    n_pad, d_in = y.shape
    d_out = flat[-1].shape[1]
    grid_m = n_pad // tm
    in_specs = ([pl.BlockSpec((tm, n_pad), lambda i: (i, 0)),       # adj stripe
                 pl.BlockSpec((n_pad, d_in), lambda i: (0, 0))]     # full y
                + [pl.BlockSpec(w.shape, lambda i: (0, 0)) for w in flat])
    return pl.pallas_call(
        functools.partial(_gnn_pass_kernel, n_u_layers=n_u_layers, tm=tm),
        out_shape=jax.ShapeDtypeStruct((n_pad, d_out), jnp.bfloat16),
        grid=(grid_m,),
        in_specs=in_specs,
        out_specs=pl.BlockSpec((tm, d_out), lambda i: (i, 0)),
        compiler_params=pltpu.CompilerParams(
            dimension_semantics=("parallel",),
            vmem_limit_bytes=_VMEM_LIMIT_BYTES),
    )(adj, y, *flat)


def _mlp_head_kernel(y_ref, xw_ref, *rest, n_hidden):
    out_ref = rest[-1]
    wr = rest[:-1]                       # w_y, w_xw, b0, (w_i, b_i)*
    h = (jnp.dot(y_ref[...], wr[0][...], preferred_element_type=jnp.float32)
         + jnp.dot(xw_ref[...], wr[1][...], preferred_element_type=jnp.float32)
         + wr[2][...])
    for li in range(n_hidden):
        h = jnp.maximum(h, 0.0)
        h = (jnp.dot(h.astype(jnp.bfloat16), wr[3 + 2 * li][...],
                     preferred_element_type=jnp.float32)
             + wr[4 + 2 * li][...])
    out_ref[...] = h


def mlp_head(y, xw, flat, *, tm, n_hidden):
    n_pad = y.shape[0]
    d_out = flat[-1].shape[1]
    in_specs = ([pl.BlockSpec((tm, y.shape[1]), lambda i: (i, 0)),
                 pl.BlockSpec((tm, xw.shape[1]), lambda i: (i, 0))]
                + [pl.BlockSpec(w.shape, lambda i: (0, 0)) for w in flat])
    return pl.pallas_call(
        functools.partial(_mlp_head_kernel, n_hidden=n_hidden),
        out_shape=jax.ShapeDtypeStruct((n_pad, d_out), jnp.float32),
        grid=(n_pad // tm,),
        in_specs=in_specs,
        out_specs=pl.BlockSpec((tm, d_out), lambda i: (i, 0)),
        compiler_params=pltpu.CompilerParams(
            dimension_semantics=("parallel",),
            vmem_limit_bytes=_VMEM_LIMIT_BYTES),
    )(y, xw, *flat)


# ----------------------------------------------------------------------------
# Parameter construction (deterministic, in-script)
# ----------------------------------------------------------------------------
def _init_linear(key, fan_in, fan_out, dtype=jnp.float32):
    kw, kb = jax.random.split(key)
    bound = 1.0 / jnp.sqrt(float(fan_in))
    w = jax.random.uniform(kw, (fan_in, fan_out), dtype, -bound, bound)
    b = jax.random.uniform(kb, (fan_out,), dtype, -bound, bound)
    return w, b


def _init_mlp(key, dims):
    keys = jax.random.split(key, len(dims) - 1)
    return [_init_linear(keys[i], dims[i], dims[i + 1])
            for i in range(len(dims) - 1)]


def init_gnn_params(key, *, n_MLP_layers, dim_MLP, dim_n2v, n_GNN_layers,
                    dim_between, dim_U, n_U_layers, l, dim_attr, dim_out):
    dim_cw = l - 1
    keys = jax.random.split(key, n_GNN_layers + 1)

    def u_dims(dim_in):
        if n_U_layers == 1:
            return [2 * dim_in, dim_between]
        return [2 * dim_in] + [dim_U] * (n_U_layers - 1) + [dim_between]

    gnn_input = _init_mlp(keys[0], u_dims(dim_attr))
    gnn_hidden = [_init_mlp(keys[1 + i], u_dims(dim_between))
                  for i in range(n_GNN_layers - 1)]

    mlp_in = dim_between + dim_n2v + dim_cw
    if n_MLP_layers > 1:
        mlp_dims = [mlp_in] + [dim_MLP] * (n_MLP_layers - 1) + [dim_out]
    else:
        mlp_dims = [mlp_in, dim_out]
    mlp = _init_mlp(keys[-1], mlp_dims)
    return dict(gnn_input=gnn_input, gnn_hidden=gnn_hidden,
                mlp_hidden=mlp[:-1], mlp_output=mlp[-1])


# ----------------------------------------------------------------------------
# Weight preparation (concat elimination + 128-lane padding, bf16 weights)
# ----------------------------------------------------------------------------
def _prep_gnn_layer(u_params, d_in, d_in_pad):
    w0, b0 = u_params[0]
    assert w0.shape[0] == 2 * d_in
    c = _round_up(w0.shape[1], 128)
    flat = [_pad2(w0[:d_in], d_in_pad, c).astype(jnp.bfloat16),     # W_y
            _pad2(w0[d_in:], d_in_pad, c).astype(jnp.bfloat16),     # W_m
            _pad2(b0.reshape(1, -1), 1, c).astype(jnp.float32)]
    r = c
    for (w, b) in u_params[1:]:
        c = _round_up(w.shape[1], 128)
        flat += [_pad2(w, r, c).astype(jnp.bfloat16),
                 _pad2(b.reshape(1, -1), 1, c).astype(jnp.float32)]
        r = c
    return flat


def _prep_mlp_head(mlp_hidden, mlp_output, d_y, d_y_pad, d_xw, d_xw_pad):
    layers = list(mlp_hidden) + [mlp_output]
    w0, b0 = layers[0]
    assert w0.shape[0] == d_y + d_xw
    c = _round_up(w0.shape[1], 128)
    flat = [_pad2(w0[:d_y], d_y_pad, c).astype(jnp.bfloat16),        # W_y
            _pad2(w0[d_y:], d_xw_pad, c).astype(jnp.bfloat16),       # W_[X|W]
            _pad2(b0.reshape(1, -1), 1, c).astype(jnp.float32)]
    r = c
    for (w, b) in layers[1:]:
        c = _round_up(w.shape[1], 128)
        flat += [_pad2(w, r, c).astype(jnp.bfloat16),
                 _pad2(b.reshape(1, -1), 1, c).astype(jnp.float32)]
        r = c
    return flat


# ----------------------------------------------------------------------------
# Forward pass
# ----------------------------------------------------------------------------
def gnn_forward(params, node_attributes, e0, e1, ds, d, X, W, *,
                n_pass=1, fuse_max_rows=_FUSE_MAX_ROWS):
    del ds, d  # TODO(synk): unused under scatter_type='sum' (no degree norm)
    n, dim_attr = node_attributes.shape
    dim_between = params["gnn_input"][-1][0].shape[1]
    dim_out = params["mlp_output"][0].shape[1]
    n_u_layers = len(params["gnn_input"])
    n_mlp_hidden = len(params["mlp_hidden"])
    if n_pass > 1 and dim_attr != dim_between:
        raise ValueError("n_pass > 1 requires dim_attr == dim_between "
                         "(the same U is re-applied per pass).")

    n_pad, tm = _row_tiling(n)
    d_attr_pad = _round_up(dim_attr, 128)
    d_xw = X.shape[1] + W.shape[1]
    d_xw_pad = _round_up(d_xw, 128)

    # Dense int8 adjacency: the edge scatter-sum becomes one MXU matmul per
    # pass; int8 halves HBM traffic on the dominant stream vs bf16.
    # TODO(synk): int8 overflows if >127 parallel edges between a node pair.
    adj = (jnp.zeros((n_pad, n_pad), jnp.int32).at[e1, e0].add(1)
           ).astype(jnp.int8)

    def pad_cast(a, rows, cols):
        a = a.astype(jnp.float32)
        return _pad2(a, rows, cols).astype(jnp.bfloat16)

    y = pad_cast(node_attributes, n_pad, d_attr_pad)          # bf16 activations
    xw = pad_cast(jnp.concatenate([X, W], axis=-1), n_pad, d_xw_pad)

    # Per-layer weight prep (split first U weight over [y | m], pad to 128).
    gnn_flats = []
    d_in, d_in_pad = dim_attr, d_attr_pad
    for u_params in [params["gnn_input"]] + list(params["gnn_hidden"]):
        flat = _prep_gnn_layer(u_params, d_in, d_in_pad)
        gnn_flats.append(flat)
        d_in, d_in_pad = dim_between, flat[-1].shape[1]
    d_y_pad = d_in_pad
    head_flat = _prep_mlp_head(params["mlp_hidden"], params["mlp_output"],
                               dim_between, d_y_pad, d_xw, d_xw_pad)
    dim_out_pad = head_flat[-1].shape[1]

    if n_pad <= fuse_max_rows:
        # Small graph: everything (all layers, all passes, head) in one call.
        out = fused_gnn(adj, y, xw, gnn_flats, head_flat, n_pass=n_pass,
                        n_u_layers=n_u_layers, n_mlp_hidden=n_mlp_hidden,
                        dim_out_pad=dim_out_pad)
    else:
        # Large graph: row-tiled per-pass kernels (bf16 y between passes).
        for flat in gnn_flats:
            for _ in range(n_pass):
                y = gnn_layer_pass(adj, y, flat, tm=tm, n_u_layers=n_u_layers)
        out = mlp_head(y, xw, head_flat, tm=tm, n_hidden=n_mlp_hidden)

    return out[:n, :dim_out]


# ----------------------------------------------------------------------------
# Example run
# ----------------------------------------------------------------------------
if __name__ == "__main__":
    N = 96            # number of nodes
    E_UND = 160       # undirected edges -> 320 directed edges
    cfg = dict(n_MLP_layers=2, dim_MLP=32, dim_n2v=16, n_GNN_layers=2,
               dim_between=32, dim_U=32, n_U_layers=2, l=8,
               dim_attr=64, dim_out=4)
    n_pass = 1
    dim_cw = cfg["l"] - 1

    key = jax.random.PRNGKey(0)
    k_attr, k_e1, k_e2, k_x, k_w, k_par = jax.random.split(key, 6)

    node_attributes = jax.random.normal(k_attr, (N, cfg["dim_attr"]), jnp.float32)

    src = jax.random.randint(k_e1, (E_UND,), 0, N)
    dst = (src + 1 + jax.random.randint(k_e2, (E_UND,), 0, N - 1)) % N
    e0 = jnp.concatenate([src, dst])                    # undirected: both dirs
    e1 = jnp.concatenate([dst, src])
    d = jnp.zeros((N,), jnp.float32).at[e1].add(1.0)    # node degrees
    ds = jnp.sqrt(jnp.maximum(d, 1.0))                  # degree sqrt (pass-through)

    X = jax.random.normal(k_x, (N, cfg["dim_n2v"]), jnp.float32)   # node2vec emb
    Wcw = jax.random.normal(k_w, (N, dim_cw), jnp.float32)         # walk feats

    params = init_gnn_params(k_par, **cfg)

    # Fused whole-graph path (small-N fast path).
    fwd_fused = jax.jit(functools.partial(gnn_forward, n_pass=n_pass))
    out_fused = jax.block_until_ready(
        fwd_fused(params, node_attributes, e0, e1, ds, d, X, Wcw))

    # Row-tiled large-N path, forced on the same graph for cross-validation.
    fwd_tiled = jax.jit(functools.partial(gnn_forward, n_pass=n_pass,
                                          fuse_max_rows=0))
    out_tiled = jax.block_until_ready(
        fwd_tiled(params, node_attributes, e0, e1, ds, d, X, Wcw))

    assert out_fused.shape == (N, cfg["dim_out"]), out_fused.shape
    assert bool(jnp.all(jnp.isfinite(out_fused)))
    assert bool(jnp.all(jnp.isfinite(out_tiled)))
    assert bool(jnp.allclose(out_fused, out_tiled, rtol=2e-2, atol=2e-2)), \
        float(jnp.max(jnp.abs(out_fused - out_tiled)))
    print("KERNEL_OK")
</pallas_src>

<mosaic_0001>
module attributes {stable_mosaic.version = 11 : i64} {
  func.func private @main(%arg0: i32) attributes {dimension_semantics = [#tpu.dimension_semantics<core_parallel>], iteration_bounds = array<i64: 2>, tpu.core_type = #tpu.core_type<sc_scalar_subcore>, window_params = []} {
    return
  }
}

module attributes {stable_mosaic.version = 11 : i64} {
  func.func private @main(%arg0: i32) attributes {dimension_semantics = [#tpu.dimension_semantics<core_parallel>], iteration_bounds = array<i64: 2>, tpu.core_type = #tpu.core_type<sc_scalar_subcore>, window_params = []} {
    return
  }
}

module attributes {stable_mosaic.version = 11 : i64} {
  func.func @_fused_gnn_kernel(%arg0: i32, %arg1: memref<128x128xi8, #tpu.memory_space<vmem>>, %arg2: memref<128x128xbf16, #tpu.memory_space<vmem>>, %arg3: memref<128x128xbf16, #tpu.memory_space<vmem>>, %arg4: memref<128x128xbf16, #tpu.memory_space<vmem>>, %arg5: memref<128x128xbf16, #tpu.memory_space<vmem>>, %arg6: memref<1x128xf32, #tpu.memory_space<vmem>>, %arg7: memref<128x128xbf16, #tpu.memory_space<vmem>>, %arg8: memref<1x128xf32, #tpu.memory_space<vmem>>, %arg9: memref<128x128xbf16, #tpu.memory_space<vmem>>, %arg10: memref<128x128xbf16, #tpu.memory_space<vmem>>, %arg11: memref<1x128xf32, #tpu.memory_space<vmem>>, %arg12: memref<128x128xbf16, #tpu.memory_space<vmem>>, %arg13: memref<1x128xf32, #tpu.memory_space<vmem>>, %arg14: memref<128x128xbf16, #tpu.memory_space<vmem>>, %arg15: memref<128x128xbf16, #tpu.memory_space<vmem>>, %arg16: memref<1x128xf32, #tpu.memory_space<vmem>>, %arg17: memref<128x128xbf16, #tpu.memory_space<vmem>>, %arg18: memref<1x128xf32, #tpu.memory_space<vmem>>, %arg19: memref<128x128xf32, #tpu.memory_space<vmem>>) attributes {dimension_semantics = [#tpu.dimension_semantics<arbitrary>], iteration_bounds = array<i64: 1>, scalar_prefetch = 0 : i64, scratch_operands = 0 : i64, tpu.core_type = #tpu.core_type<tc>, window_params = [{pipeline_mode = #tpu.pipeline_mode<synchronous>, transform_indices = @transform_0, window_bounds = array<i64: 128, 128>}, {pipeline_mode = #tpu.pipeline_mode<synchronous>, transform_indices = @transform_1, window_bounds = array<i64: 128, 128>}, {pipeline_mode = #tpu.pipeline_mode<synchronous>, transform_indices = @transform_2, window_bounds = array<i64: 128, 128>}, {pipeline_mode = #tpu.pipeline_mode<synchronous>, transform_indices = @transform_3, window_bounds = array<i64: 128, 128>}, {pipeline_mode = #tpu.pipeline_mode<synchronous>, transform_indices = @transform_4, window_bounds = array<i64: 128, 128>}, {pipeline_mode = #tpu.pipeline_mode<synchronous>, transform_indices = @transform_5, window_bounds = array<i64: 1, 128>}, {pipeline_mode = #tpu.pipeline_mode<synchronous>, transform_indices = @transform_6, window_bounds = array<i64: 128, 128>}, {pipeline_mode = #tpu.pipeline_mode<synchronous>, transform_indices = @transform_7, window_bounds = array<i64: 1, 128>}, {pipeline_mode = #tpu.pipeline_mode<synchronous>, transform_indices = @transform_8, window_bounds = array<i64: 128, 128>}, {pipeline_mode = #tpu.pipeline_mode<synchronous>, transform_indices = @transform_9, window_bounds = array<i64: 128, 128>}, {pipeline_mode = #tpu.pipeline_mode<synchronous>, transform_indices = @transform_10, window_bounds = array<i64: 1, 128>}, {pipeline_mode = #tpu.pipeline_mode<synchronous>, transform_indices = @transform_11, window_bounds = array<i64: 128, 128>}, {pipeline_mode = #tpu.pipeline_mode<synchronous>, transform_indices = @transform_12, window_bounds = array<i64: 1, 128>}, {pipeline_mode = #tpu.pipeline_mode<synchronous>, transform_indices = @transform_13, window_bounds = array<i64: 128, 128>}, {pipeline_mode = #tpu.pipeline_mode<synchronous>, transform_indices = @transform_14, window_bounds = array<i64: 128, 128>}, {pipeline_mode = #tpu.pipeline_mode<synchronous>, transform_indices = @transform_15, window_bounds = array<i64: 1, 128>}, {pipeline_mode = #tpu.pipeline_mode<synchronous>, transform_indices = @transform_16, window_bounds = array<i64: 128, 128>}, {pipeline_mode = #tpu.pipeline_mode<synchronous>, transform_indices = @transform_17, window_bounds = array<i64: 1, 128>}, {pipeline_mode = #tpu.pipeline_mode<synchronous>, transform_indices = @transform_18, window_bounds = array<i64: 128, 128>}]} {
    %c0 = arith.constant 0 : index
    %c0_0 = arith.constant 0 : index
    %0 = vector.load %arg1[%c0, %c0_0] : memref<128x128xi8, #tpu.memory_space<vmem>>, vector<128x128xi8>
    %1 = arith.sitofp %0 : vector<128x128xi8> to vector<128x128xf32>
    %2 = arith.truncf %1 : vector<128x128xf32> to vector<128x128xbf16>
    %c0_1 = arith.constant 0 : index
    %c0_2 = arith.constant 0 : index
    %3 = vector.load %arg2[%c0_1, %c0_2] : memref<128x128xbf16, #tpu.memory_space<vmem>>, vector<128x128xbf16>
    %cst = arith.constant dense<0.000000e+00> : vector<128x128xf32>
    %4 = tpu.matmul %2, %3, %cst {dimension_numbers = #tpu.dot_dimension_numbers<[1], [0], [0], [1], [0, 0, 1, 1], [], []>} : vector<128x128xbf16>, vector<128x128xbf16>, vector<128x128xf32> -> vector<128x128xf32>
    %c0_3 = arith.constant 0 : index
    %c0_4 = arith.constant 0 : index
    %5 = vector.load %arg4[%c0_3, %c0_4] : memref<128x128xbf16, #tpu.memory_space<vmem>>, vector<128x128xbf16>
    %cst_5 = arith.constant dense<0.000000e+00> : vector<128x128xf32>
    %6 = tpu.matmul %3, %5, %cst_5 {dimension_numbers = #tpu.dot_dimension_numbers<[1], [0], [0], [1], [0, 0, 1, 1], [], []>} : vector<128x128xbf16>, vector<128x128xbf16>, vector<128x128xf32> -> vector<128x128xf32>
    %7 = arith.truncf %4 : vector<128x128xf32> to vector<128x128xbf16>
    %c0_6 = arith.constant 0 : index
    %c0_7 = arith.constant 0 : index
    %8 = vector.load %arg5[%c0_6, %c0_7] : memref<128x128xbf16, #tpu.memory_space<vmem>>, vector<128x128xbf16>
    %cst_8 = arith.constant dense<0.000000e+00> : vector<128x128xf32>
    %9 = tpu.matmul %7, %8, %cst_8 {dimension_numbers = #tpu.dot_dimension_numbers<[1], [0], [0], [1], [0, 0, 1, 1], [], []>} : vector<128x128xbf16>, vector<128x128xbf16>, vector<128x128xf32> -> vector<128x128xf32>
    %10 = arith.addf %6, %9 : vector<128x128xf32>
    %c0_9 = arith.constant 0 : index
    %c0_10 = arith.constant 0 : index
    %11 = vector.load %arg6[%c0_9, %c0_10] : memref<1x128xf32, #tpu.memory_space<vmem>>, vector<1x128xf32>
    %12 = vector.broadcast %11 : vector<1x128xf32> to vector<128x128xf32>
    %13 = arith.addf %10, %12 : vector<128x128xf32>
    %cst_11 = arith.constant 0.000000e+00 : f32
    %14 = vector.broadcast %cst_11 : f32 to vector<128x128xf32>
    %15 = arith.maximumf %13, %14 : vector<128x128xf32>
    %16 = arith.truncf %15 : vector<128x128xf32> to vector<128x128xbf16>
    %c0_12 = arith.constant 0 : index
    %c0_13 = arith.constant 0 : index
    %17 = vector.load %arg7[%c0_12, %c0_13] : memref<128x128xbf16, #tpu.memory_space<vmem>>, vector<128x128xbf16>
    %cst_14 = arith.constant dense<0.000000e+00> : vector<128x128xf32>
    %18 = tpu.matmul %16, %17, %cst_14 {dimension_numbers = #tpu.dot_dimension_numbers<[1], [0], [0], [1], [0, 0, 1, 1], [], []>} : vector<128x128xbf16>, vector<128x128xbf16>, vector<128x128xf32> -> vector<128x128xf32>
    %c0_15 = arith.constant 0 : index
    %c0_16 = arith.constant 0 : index
    %19 = vector.load %arg8[%c0_15, %c0_16] : memref<1x128xf32, #tpu.memory_space<vmem>>, vector<1x128xf32>
    %20 = vector.broadcast %19 : vector<1x128xf32> to vector<128x128xf32>
    %21 = arith.addf %18, %20 : vector<128x128xf32>
    %22 = arith.truncf %21 : vector<128x128xf32> to vector<128x128xbf16>
    %cst_17 = arith.constant dense<0.000000e+00> : vector<128x128xf32>
    %23 = tpu.matmul %2, %22, %cst_17 {dimension_numbers = #tpu.dot_dimension_numbers<[1], [0], [0], [1], [0, 0, 1, 1], [], []>} : vector<128x128xbf16>, vector<128x128xbf16>, vector<128x128xf32> -> vector<128x128xf32>
    %c0_18 = arith.constant 0 : index
    %c0_19 = arith.constant 0 : index
    %24 = vector.load %arg9[%c0_18, %c0_19] : memref<128x128xbf16, #tpu.memory_space<vmem>>, vector<128x128xbf16>
    %cst_20 = arith.constant dense<0.000000e+00> : vector<128x128xf32>
    %25 = tpu.matmul %22, %24, %cst_20 {dimension_numbers = #tpu.dot_dimension_numbers<[1], [0], [0], [1], [0, 0, 1, 1], [], []>} : vector<128x128xbf16>, vector<128x128xbf16>, vector<128x128xf32> -> vector<128x128xf32>
    %26 = arith.truncf %23 : vector<128x128xf32> to vector<128x128xbf16>
    %c0_21 = arith.constant 0 : index
    %c0_22 = arith.constant 0 : index
    %27 = vector.load %arg10[%c0_21, %c0_22] : memref<128x128xbf16, #tpu.memory_space<vmem>>, vector<128x128xbf16>
    %cst_23 = arith.constant dense<0.000000e+00> : vector<128x128xf32>
    %28 = tpu.matmul %26, %27, %cst_23 {dimension_numbers = #tpu.dot_dimension_numbers<[1], [0], [0], [1], [0, 0, 1, 1], [], []>} : vector<128x128xbf16>, vector<128x128xbf16>, vector<128x128xf32> -> vector<128x128xf32>
    %29 = arith.addf %25, %28 : vector<128x128xf32>
    %c0_24 = arith.constant 0 : index
    %c0_25 = arith.constant 0 : index
    %30 = vector.load %arg11[%c0_24, %c0_25] : memref<1x128xf32, #tpu.memory_space<vmem>>, vector<1x128xf32>
    %31 = vector.broadcast %30 : vector<1x128xf32> to vector<128x128xf32>
    %32 = arith.addf %29, %31 : vector<128x128xf32>
    %cst_26 = arith.constant 0.000000e+00 : f32
    %33 = vector.broadcast %cst_26 : f32 to vector<128x128xf32>
    %34 = arith.maximumf %32, %33 : vector<128x128xf32>
    %35 = arith.truncf %34 : vector<128x128xf32> to vector<128x128xbf16>
    %c0_27 = arith.constant 0 : index
    %c0_28 = arith.constant 0 : index
    %36 = vector.load %arg12[%c0_27, %c0_28] : memref<128x128xbf16, #tpu.memory_space<vmem>>, vector<128x128xbf16>
    %cst_29 = arith.constant dense<0.000000e+00> : vector<128x128xf32>
    %37 = tpu.matmul %35, %36, %cst_29 {dimension_numbers = #tpu.dot_dimension_numbers<[1], [0], [0], [1], [0, 0, 1, 1], [], []>} : vector<128x128xbf16>, vector<128x128xbf16>, vector<128x128xf32> -> vector<128x128xf32>
    %c0_30 = arith.constant 0 : index
    %c0_31 = arith.constant 0 : index
    %38 = vector.load %arg13[%c0_30, %c0_31] : memref<1x128xf32, #tpu.memory_space<vmem>>, vector<1x128xf32>
    %39 = vector.broadcast %38 : vector<1x128xf32> to vector<128x128xf32>
    %40 = arith.addf %37, %39 : vector<128x128xf32>
    %41 = arith.truncf %40 : vector<128x128xf32> to vector<128x128xbf16>
    %c0_32 = arith.constant 0 : index
    %c0_33 = arith.constant 0 : index
    %42 = vector.load %arg14[%c0_32, %c0_33] : memref<128x128xbf16, #tpu.memory_space<vmem>>, vector<128x128xbf16>
    %cst_34 = arith.constant dense<0.000000e+00> : vector<128x128xf32>
    %43 = tpu.matmul %41, %42, %cst_34 {dimension_numbers = #tpu.dot_dimension_numbers<[1], [0], [0], [1], [0, 0, 1, 1], [], []>} : vector<128x128xbf16>, vector<128x128xbf16>, vector<128x128xf32> -> vector<128x128xf32>
    %c0_35 = arith.constant 0 : index
    %c0_36 = arith.constant 0 : index
    %44 = vector.load %arg3[%c0_35, %c0_36] : memref<128x128xbf16, #tpu.memory_space<vmem>>, vector<128x128xbf16>
    %c0_37 = arith.constant 0 : index
    %c0_38 = arith.constant 0 : index
    %45 = vector.load %arg15[%c0_37, %c0_38] : memref<128x128xbf16, #tpu.memory_space<vmem>>, vector<128x128xbf16>
    %cst_39 = arith.constant dense<0.000000e+00> : vector<128x128xf32>
    %46 = tpu.matmul %44, %45, %cst_39 {dimension_numbers = #tpu.dot_dimension_numbers<[1], [0], [0], [1], [0, 0, 1, 1], [], []>} : vector<128x128xbf16>, vector<128x128xbf16>, vector<128x128xf32> -> vector<128x128xf32>
    %47 = arith.addf %43, %46 : vector<128x128xf32>
    %c0_40 = arith.constant 0 : index
    %c0_41 = arith.constant 0 : index
    %48 = vector.load %arg16[%c0_40, %c0_41] : memref<1x128xf32, #tpu.memory_space<vmem>>, vector<1x128xf32>
    %49 = vector.broadcast %48 : vector<1x128xf32> to vector<128x128xf32>
    %50 = arith.addf %47, %49 : vector<128x128xf32>
    %cst_42 = arith.constant 0.000000e+00 : f32
    %51 = vector.broadcast %cst_42 : f32 to vector<128x128xf32>
    %52 = arith.maximumf %50, %51 : vector<128x128xf32>
    %53 = arith.truncf %52 : vector<128x128xf32> to vector<128x128xbf16>
    %c0_43 = arith.constant 0 : index
    %c0_44 = arith.constant 0 : index
    %54 = vector.load %arg17[%c0_43, %c0_44] : memref<128x128xbf16, #tpu.memory_space<vmem>>, vector<128x128xbf16>
    %cst_45 = arith.constant dense<0.000000e+00> : vector<128x128xf32>
    %55 = tpu.matmul %53, %54, %cst_45 {dimension_numbers = #tpu.dot_dimension_numbers<[1], [0], [0], [1], [0, 0, 1, 1], [], []>} : vector<128x128xbf16>, vector<128x128xbf16>, vector<128x128xf32> -> vector<128x128xf32>
    %c0_46 = arith.constant 0 : index
    %c0_47 = arith.constant 0 : index
    %56 = vector.load %arg18[%c0_46, %c0_47] : memref<1x128xf32, #tpu.memory_space<vmem>>, vector<1x128xf32>
    %57 = vector.broadcast %56 : vector<1x128xf32> to vector<128x128xf32>
    %58 = arith.addf %55, %57 : vector<128x128xf32>
    %c0_48 = arith.constant 0 : index
    %c0_49 = arith.constant 0 : index
    %59 = vector.load %arg19[%c0_48, %c0_49] : memref<128x128xf32, #tpu.memory_space<vmem>>, vector<128x128xf32>
    tpu.vector_store %arg19[%c0_48, %c0_49], %58 {strides = array<i32>} : memref<128x128xf32, #tpu.memory_space<vmem>>, vector<128x128xf32>,
    return
  }
  func.func @transform_0(%arg0: i32) -> (i32, i32) {
    %c0_i32 = arith.constant 0 : i32
    %c0_i32_0 = arith.constant 0 : i32
    %c0_i32_1 = arith.constant 0 : i32
    return %c0_i32, %c0_i32_0 : i32, i32
  }
  func.func @transform_1(%arg0: i32) -> (i32, i32) {
    %c0_i32 = arith.constant 0 : i32
    %c0_i32_0 = arith.constant 0 : i32
    %c0_i32_1 = arith.constant 0 : i32
    return %c0_i32, %c0_i32_0 : i32, i32
  }
  func.func @transform_2(%arg0: i32) -> (i32, i32) {
    %c0_i32 = arith.constant 0 : i32
    %c0_i32_0 = arith.constant 0 : i32
    %c0_i32_1 = arith.constant 0 : i32
    return %c0_i32, %c0_i32_0 : i32, i32
  }
  func.func @transform_3(%arg0: i32) -> (i32, i32) {
    %c0_i32 = arith.constant 0 : i32
    %c0_i32_0 = arith.constant 0 : i32
    %c0_i32_1 = arith.constant 0 : i32
    return %c0_i32, %c0_i32_0 : i32, i32
  }
  func.func @transform_4(%arg0: i32) -> (i32, i32) {
    %c0_i32 = arith.constant 0 : i32
    %c0_i32_0 = arith.constant 0 : i32
    %c0_i32_1 = arith.constant 0 : i32
    return %c0_i32, %c0_i32_0 : i32, i32
  }
  func.func @transform_5(%arg0: i32) -> (i32, i32) {
    %c0_i32 = arith.constant 0 : i32
    %c0_i32_0 = arith.constant 0 : i32
    %c0_i32_1 = arith.constant 0 : i32
    return %c0_i32, %c0_i32_0 : i32, i32
  }
  func.func @transform_6(%arg0: i32) -> (i32, i32) {
    %c0_i32 = arith.constant 0 : i32
    %c0_i32_0 = arith.constant 0 : i32
    %c0_i32_1 = arith.constant 0 : i32
    return %c0_i32, %c0_i32_0 : i32, i32
  }
  func.func @transform_7(%arg0: i32) -> (i32, i32) {
    %c0_i32 = arith.constant 0 : i32
    %c0_i32_0 = arith.constant 0 : i32
    %c0_i32_1 = arith.constant 0 : i32
    return %c0_i32, %c0_i32_0 : i32, i32
  }
  func.func @transform_8(%arg0: i32) -> (i32, i32) {
    %c0_i32 = arith.constant 0 : i32
    %c0_i32_0 = arith.constant 0 : i32
    %c0_i32_1 = arith.constant 0 : i32
    return %c0_i32, %c0_i32_0 : i32, i32
  }
  func.func @transform_9(%arg0: i32) -> (i32, i32) {
    %c0_i32 = arith.constant 0 : i32
    %c0_i32_0 = arith.constant 0 : i32
    %c0_i32_1 = arith.constant 0 : i32
    return %c0_i32, %c0_i32_0 : i32, i32
  }
  func.func @transform_10(%arg0: i32) -> (i32, i32) {
    %c0_i32 = arith.constant 0 : i32
    %c0_i32_0 = arith.constant 0 : i32
    %c0_i32_1 = arith.constant 0 : i32
    return %c0_i32, %c0_i32_0 : i32, i32
  }
  func.func @transform_11(%arg0: i32) -> (i32, i32) {
    %c0_i32 = arith.constant 0 : i32
    %c0_i32_0 = arith.constant 0 : i32
    %c0_i32_1 = arith.constant 0 : i32
    return %c0_i32, %c0_i32_0 : i32, i32
  }
  func.func @transform_12(%arg0: i32) -> (i32, i32) {
    %c0_i32 = arith.constant 0 : i32
    %c0_i32_0 = arith.constant 0 : i32
    %c0_i32_1 = arith.constant 0 : i32
    return %c0_i32, %c0_i32_0 : i32, i32
  }
  func.func @transform_13(%arg0: i32) -> (i32, i32) {
    %c0_i32 = arith.constant 0 : i32
    %c0_i32_0 = arith.constant 0 : i32
    %c0_i32_1 = arith.constant 0 : i32
    return %c0_i32, %c0_i32_0 : i32, i32
  }
  func.func @transform_14(%arg0: i32) -> (i32, i32) {
    %c0_i32 = arith.constant 0 : i32
    %c0_i32_0 = arith.constant 0 : i32
    %c0_i32_1 = arith.constant 0 : i32
    return %c0_i32, %c0_i32_0 : i32, i32
  }
  func.func @transform_15(%arg0: i32) -> (i32, i32) {
    %c0_i32 = arith.constant 0 : i32
    %c0_i32_0 = arith.constant 0 : i32
    %c0_i32_1 = arith.constant 0 : i32
    return %c0_i32, %c0_i32_0 : i32, i32
  }
  func.func @transform_16(%arg0: i32) -> (i32, i32) {
    %c0_i32 = arith.constant 0 : i32
    %c0_i32_0 = arith.constant 0 : i32
    %c0_i32_1 = arith.constant 0 : i32
    return %c0_i32, %c0_i32_0 : i32, i32
  }
  func.func @transform_17(%arg0: i32) -> (i32, i32) {
    %c0_i32 = arith.constant 0 : i32
    %c0_i32_0 = arith.constant 0 : i32
    %c0_i32_1 = arith.constant 0 : i32
    return %c0_i32, %c0_i32_0 : i32, i32
  }
  func.func @transform_18(%arg0: i32) -> (i32, i32) {
    %c0_i32 = arith.constant 0 : i32
    %c0_i32_0 = arith.constant 0 : i32
    %c0_i32_1 = arith.constant 0 : i32
    return %c0_i32, %c0_i32_0 : i32, i32
  }
}

</mosaic_0001>

<bundles_post_ra>
// kernel: gnn_forward.1
= control target key start
LH: loop header
LB: loop body
LE: loop exit
PB: predicated region body
PF: predicated region fallthrough
CT: control target
= control target key end

     0   :  { %s4064_s0 = inlined_call_operand.hbm [shape: s8[128,128], index: 0, kind: input, shape index: {}]   ;;  %s4065_s1 = inlined_call_operand.hbm [shape: bf16[128,128], index: 1, kind: input, shape index: {}]   ;;  %s4066_s2 = inlined_call_operand.hbm [shape: bf16[128,128], index: 2, kind: input, shape index: {}]   ;;  %s4067_s3 = inlined_call_operand.hbm [shape: bf16[128,128], index: 3, kind: input, shape index: {}]   ;;  %s4068_s4 = inlined_call_operand.hbm [shape: bf16[128,128], index: 4, kind: input, shape index: {}]   ;;  %s4069_s5 = inlined_call_operand.hbm [shape: f32[1,128], index: 5, kind: input, shape index: {}]   ;;  %s4070_s6 = inlined_call_operand.hbm [shape: bf16[128,128], index: 6, kind: input, shape index: {}]   ;;  %s4071_s7 = inlined_call_operand.hbm [shape: f32[1,128], index: 7, kind: input, shape index: {}]   ;;  %s4072_s8 = inlined_call_operand.hbm [shape: bf16[128,128], index: 8, kind: input, shape index: {}]   ;;  %s4073_s9 = inlined_call_operand.hbm [shape: bf16[128,128], index: 9, kind: input, shape index: {}]   ;;  %s4074_s10 = inlined_call_operand.hbm [shape: f32[1,128], index: 10, kind: input, shape index: {}]   ;;  %s4075_s11 = inlined_call_operand.hbm [shape: bf16[128,128], index: 11, kind: input, shape index: {}]   ;;  %s4076_s12 = inlined_call_operand.hbm [shape: f32[1,128], index: 12, kind: input, shape index: {}]   ;;  %s4077_s13 = inlined_call_operand.hbm [shape: bf16[128,128], index: 13, kind: input, shape index: {}]   ;;  %s4078_s14 = inlined_call_operand.hbm [shape: bf16[128,128], index: 14, kind: input, shape index: {}]   ;;  %s4079_s15 = inlined_call_operand.hbm [shape: f32[1,128], index: 15, kind: input, shape index: {}]   ;;  %s4080_s16 = inlined_call_operand.hbm [shape: bf16[128,128], index: 16, kind: input, shape index: {}]   ;;  %s4081_s17 = inlined_call_operand.hbm [shape: f32[1,128], index: 17, kind: input, shape index: {}]   ;;  %s4082_s18 = inlined_call_operand.hbm [shape: f32[128,128], index: 18, kind: output, shape index: {}]  }
   0x1   :  { %4088 = sst [smem:[#allocation43_spill]] %s4064_s0 }
   0x2   :  { %4089 = sst [smem:[#allocation44_spill]] %s4065_s1 }
   0x3   :  { %4090 = sst [smem:[#allocation45_spill]] %s4066_s2 }
   0x4   :  { %4091 = sst [smem:[#allocation46_spill]] %s4081_s17 }
   0x5   :  { %4092 = sst [smem:[#allocation47_spill]] %s4082_s18 }
   0x6   :  { %23 = vsyncpa [#allocation3], 0 }
   0x7   :  { %24 = vsyncpa [#allocation6], 0 }
   0x8   :  { %25 = vsyncpa [#allocation9], 0 }
   0x9   :  { %26 = vsyncpa [#allocation12], 0 }
   0xa   :  { %27 = vsyncpa [#allocation15], 0 }
   0xb   :  { %28 = vsyncpa [#allocation18], 0 }
   0xc   :  { %29 = vsyncpa [#allocation21], 0 }
   0xd   :  { %30 = vsyncpa [#allocation24], 0 }
   0xe   :  { %31 = vsyncpa [#allocation27], 0 }
   0xf   :  { %32 = vsyncpa [#allocation30], 0 }
  0x10   :  { %33 = vsyncpa [#allocation4], 0  ;;  %s3533_s27 = smov [#allocation5]   ;;  %s4093_s0 = sld [smem:[#allocation44_spill]] }
  0x11   :  { %s51_s28 = sshll.u32 %s3533_s27, 4  ;;  %s52_s28 = int_to_ptr.vmem [resolvable:$true] %s51_s28 }
  0x16   :  { %s3093_s19 = scalar_lea.hbm %s4093_s0, 1024 }
  0x17   :  { %p3094_p0 = scmp.ne.s32.totalorder %s4093_s0, %s3093_s19  ;;  %p3097_p1 = scmp.lt.u32.totalorder %s3093_s19, %s4093_s0 }
  0x19   :  { %p3099_p2 = pnand %p3097_p1, %p3094_p0 }
  0x1b   :  { %3102 = shalt.err (!%p3099_p2)
}
  0x1c   :  { %s3103_s2 = scalar_lea.vmem %s52_s28, 1024  ;;  %p3108_p4 = scmp.lt.s32.totalorder %s52_s28, %s52_s28 }
  0x1d   :  { %p3104_p3 = scmp.ne.s32.totalorder %s52_s28, %s3103_s2  ;;  %p3109_p5 = scmp.lt.s32.totalorder %s3103_s2, %s3103_s2 }
  0x1f   :  { %p3110_p6 = por %p3109_p5, %p3108_p4 }
  0x21   :  { %p3111_p7 = pnand %p3110_p6, %p3104_p3 }
  0x23   :  { %3114 = shalt.err (!%p3111_p7)
}
  0x24   :  { %s3534_s23 = smov 64   ;;  %s3535_s24 = smov 4  }
  0x25   :  { %57 = dma.hbm_to_vmem [thread:$0]  %s4093_s0, 1024, %s52_s28, [#allocation6], %s3534_s23, %s3534_s23, %s3535_s24  }
  0x26   :  { %s3536_s27 = smov [#allocation8]   ;;  %s3537_s30 = smov [#allocation11]  }
  0x27   :  { %s75_s29 = sshll.u32 %s3536_s27, 4  ;;  %s100_s19 = sshll.u32 %s3537_s30, 4  ;;  %s76_s29 = int_to_ptr.vmem [resolvable:$true] %s75_s29  ;;  %s101_s19 = int_to_ptr.vmem [resolvable:$true] %s100_s19 }
  0x28   :  { %s3115_s21 = scalar_lea.hbm %s4067_s3, 1024 }
  0x29   :  { %p3116_p8 = scmp.ne.s32.totalorder %s4067_s3, %s3115_s21  ;;  %p3119_p9 = scmp.lt.u32.totalorder %s3115_s21, %s4067_s3 }
  0x2b   :  { %p3121_p10 = pnand %p3119_p9, %p3116_p8 }
  0x2d   :  { %3124 = shalt.err (!%p3121_p10)
}
  0x2e   :  { %s3125_s28 = scalar_lea.vmem %s76_s29, 1024  ;;  %p3130_p12 = scmp.lt.s32.totalorder %s76_s29, %s76_s29 }
  0x2f   :  { %p3126_p11 = scmp.ne.s32.totalorder %s76_s29, %s3125_s28  ;;  %p3131_p13 = scmp.lt.s32.totalorder %s3125_s28, %s3125_s28 }
  0x31   :  { %p3132_p0 = por %p3131_p13, %p3130_p12 }
  0x33   :  { %p3133_p1 = pnand %p3132_p0, %p3126_p11 }
  0x35   :  { %3136 = shalt.err (!%p3133_p1)
}
  0x36   :  { %81 = dma.hbm_to_vmem [thread:$0]  %s4067_s3, 1024, %s76_s29, [#allocation9], %s3534_s23, %s3534_s23, %s3535_s24  }
  0x37   :  { %s3137_s18 = scalar_lea.hbm %s4069_s5, 16 }
  0x38   :  { %p3138_p2 = scmp.ne.s32.totalorder %s4069_s5, %s3137_s18  ;;  %p3141_p3 = scmp.lt.u32.totalorder %s3137_s18, %s4069_s5 }
  0x3a   :  { %p3143_p4 = pnand %p3141_p3, %p3138_p2 }
  0x3c   :  { %3146 = shalt.err (!%p3143_p4)
}
  0x3d   :  { %s3147_s21 = scalar_lea.vmem %s101_s19, 16  ;;  %s3151_s22 = scalar_lea.vmem %s101_s19, 32 }
  0x3e   :  { %p3148_p5 = scmp.ne.s32.totalorder %s101_s19, %s3147_s21  ;;  %p3152_p6 = scmp.lt.s32.totalorder %s101_s19, %s101_s19 }
  0x3f   :  { %p3153_p7 = scmp.lt.s32.totalorder %s3151_s22, %s3147_s21 }
  0x41   :  { %p3154_p8 = por %p3153_p7, %p3152_p6 }
  0x43   :  { %p3155_p9 = pnand %p3154_p8, %p3148_p5 }
  0x45   :  { %3158 = shalt.err (!%p3155_p9)
}
  0x46   :  { %103 = dma.hbm_to_vmem [thread:$0]  %s4069_s5, 16, %s101_s19, [#allocation12]  }
  0x47   :  { %s3538_s2 = smov [#allocation14]   ;;  %s3539_s0 = smov [#allocation17]  }
  0x48   :  { %s122_s28 = sshll.u32 %s3538_s2, 4  ;;  %s143_s25 = sshll.u32 %s3539_s0, 4  ;;  %s123_s28 = int_to_ptr.vmem [resolvable:$true] %s122_s28  ;;  %s144_s25 = int_to_ptr.vmem [resolvable:$true] %s143_s25 }
  0x49   :  { %s3159_s18 = scalar_lea.hbm %s4071_s7, 16 }
  0x4a   :  { %p3160_p10 = scmp.ne.s32.totalorder %s4071_s7, %s3159_s18  ;;  %p3163_p11 = scmp.lt.u32.totalorder %s3159_s18, %s4071_s7 }
  0x4c   :  { %p3165_p12 = pnand %p3163_p11, %p3160_p10 }
  0x4e   :  { %3168 = shalt.err (!%p3165_p12)
}
  0x4f   :  { %s3169_s5 = scalar_lea.vmem %s123_s28, 16  ;;  %s3173_s19 = scalar_lea.vmem %s123_s28, 32 }
  0x50   :  { %p3170_p13 = scmp.ne.s32.totalorder %s123_s28, %s3169_s5  ;;  %p3174_p0 = scmp.lt.s32.totalorder %s123_s28, %s123_s28 }
  0x51   :  { %p3175_p1 = scmp.lt.s32.totalorder %s3173_s19, %s3169_s5 }
  0x53   :  { %p3176_p2 = por %p3175_p1, %p3174_p0 }
  0x55   :  { %p3177_p3 = pnand %p3176_p2, %p3170_p13 }
  0x57   :  { %3180 = shalt.err (!%p3177_p3)
}
  0x58   :  { %125 = dma.hbm_to_vmem [thread:$0]  %s4071_s7, 16, %s123_s28, [#allocation15]  }
  0x59   :  { %s3181_s2 = scalar_lea.hbm %s4073_s9, 1024 }
  0x5a   :  { %p3182_p4 = scmp.ne.s32.totalorder %s4073_s9, %s3181_s2  ;;  %p3185_p5 = scmp.lt.u32.totalorder %s3181_s2, %s4073_s9 }
  0x5c   :  { %p3187_p6 = pnand %p3185_p5, %p3182_p4 }
  0x5e   :  { %3190 = shalt.err (!%p3187_p6)
}
  0x5f   :  { %s3191_s27 = scalar_lea.vmem %s144_s25, 1024  ;;  %p3196_p8 = scmp.lt.s32.totalorder %s144_s25, %s144_s25 }
  0x60   :  { %p3192_p7 = scmp.ne.s32.totalorder %s144_s25, %s3191_s27  ;;  %p3197_p9 = scmp.lt.s32.totalorder %s3191_s27, %s3191_s27 }
  0x62   :  { %p3198_p10 = por %p3197_p9, %p3196_p8 }
  0x64   :  { %p3199_p11 = pnand %p3198_p10, %p3192_p7 }
  0x66   :  { %3202 = shalt.err (!%p3199_p11)
}
  0x67   :  { %149 = dma.hbm_to_vmem [thread:$0]  %s4073_s9, 1024, %s144_s25, [#allocation18], %s3534_s23, %s3534_s23, %s3535_s24  }
  0x68   :  { %s3540_s30 = smov [#allocation20]   ;;  %s3541_s20 = smov [#allocation23]  }
  0x69   :  { %s165_s1 = sshll.u32 %s3540_s30, 4  ;;  %s187_s5 = sshll.u32 %s3541_s20, 4  ;;  %s166_s1 = int_to_ptr.vmem [resolvable:$true] %s165_s1  ;;  %s188_s5 = int_to_ptr.vmem [resolvable:$true] %s187_s5 }
  0x6a   :  { %s3203_s22 = scalar_lea.hbm %s4075_s11, 1024 }
  0x6b   :  { %p3204_p12 = scmp.ne.s32.totalorder %s4075_s11, %s3203_s22  ;;  %p3207_p13 = scmp.lt.u32.totalorder %s3203_s22, %s4075_s11 }
  0x6d   :  { %p3209_p0 = pnand %p3207_p13, %p3204_p12 }
  0x6f   :  { %3212 = shalt.err (!%p3209_p0)
}
  0x70   :  { %s3213_s9 = scalar_lea.vmem %s166_s1, 1024  ;;  %p3218_p2 = scmp.lt.s32.totalorder %s166_s1, %s166_s1 }
  0x71   :  { %p3214_p1 = scmp.ne.s32.totalorder %s166_s1, %s3213_s9  ;;  %p3219_p3 = scmp.lt.s32.totalorder %s3213_s9, %s3213_s9 }
  0x73   :  { %p3220_p4 = por %p3219_p3, %p3218_p2 }
  0x75   :  { %p3221_p5 = pnand %p3220_p4, %p3214_p1 }
  0x77   :  { %3224 = shalt.err (!%p3221_p5)
}
  0x78   :  { %171 = dma.hbm_to_vmem [thread:$0]  %s4075_s11, 1024, %s166_s1, [#allocation21], %s3534_s23, %s3534_s23, %s3535_s24  }
  0x79   :  { %s3225_s27 = scalar_lea.hbm %s4077_s13, 1024 }
  0x7a   :  { %p3226_p6 = scmp.ne.s32.totalorder %s4077_s13, %s3225_s27  ;;  %p3229_p7 = scmp.lt.u32.totalorder %s3225_s27, %s4077_s13 }
  0x7c   :  { %p3231_p8 = pnand %p3229_p7, %p3226_p6 }
  0x7e   :  { %3234 = shalt.err (!%p3231_p8)
}
  0x7f   :  { %s3235_s19 = scalar_lea.vmem %s188_s5, 1024  ;;  %p3240_p10 = scmp.lt.s32.totalorder %s188_s5, %s188_s5 }
  0x80   :  { %p3236_p9 = scmp.ne.s32.totalorder %s188_s5, %s3235_s19  ;;  %p3241_p11 = scmp.lt.s32.totalorder %s3235_s19, %s3235_s19 }
  0x82   :  { %p3242_p12 = por %p3241_p11, %p3240_p10 }
  0x84   :  { %p3243_p13 = pnand %p3242_p12, %p3236_p9 }
  0x86   :  { %3246 = shalt.err (!%p3243_p13)
}
  0x87   :  { %193 = dma.hbm_to_vmem [thread:$0]  %s4077_s13, 1024, %s188_s5, [#allocation24], %s3534_s23, %s3534_s23, %s3535_s24  }
  0x88   :  { %s3542_s21 = smov [#allocation26]   ;;  %s3543_s3 = smov [#allocation2]  }
  0x89   :  { %s212_s22 = sshll.u32 %s3542_s21, 4  ;;  %s39_s29 = sshll.u32 %s3543_s3, 4  ;;  %s213_s22 = int_to_ptr.vmem [resolvable:$true] %s212_s22  ;;  %s40_s29 = int_to_ptr.vmem [resolvable:$true] %s39_s29 }
  0x8a   :  { %s3247_s9 = scalar_lea.hbm %s4079_s15, 16 }
  0x8b   :  { %p3248_p0 = scmp.ne.s32.totalorder %s4079_s15, %s3247_s9  ;;  %p3251_p1 = scmp.lt.u32.totalorder %s3247_s9, %s4079_s15 }
  0x8d   :  { %p3253_p2 = pnand %p3251_p1, %p3248_p0 }
  0x8f   :  { %3256 = shalt.err (!%p3253_p2)
}
  0x90   :  { %s3257_s13 = scalar_lea.vmem %s213_s22, 16  ;;  %s3261_s5 = scalar_lea.vmem %s213_s22, 32 }
  0x91   :  { %p3258_p3 = scmp.ne.s32.totalorder %s213_s22, %s3257_s13  ;;  %p3262_p4 = scmp.lt.s32.totalorder %s213_s22, %s213_s22 }
  0x92   :  { %p3263_p5 = scmp.lt.s32.totalorder %s3261_s5, %s3257_s13 }
  0x94   :  { %p3264_p6 = por %p3263_p5, %p3262_p4 }
  0x96   :  { %p3265_p7 = pnand %p3264_p6, %p3258_p3 }
  0x98   :  { %3268 = shalt.err (!%p3265_p7)
}
  0x99   :  { %215 = dma.hbm_to_vmem [thread:$0]  %s4079_s15, 16, %s213_s22, [#allocation27]  }
  0x9a   :  { %s4094_s20 = sld [smem:[#allocation43_spill]] }
  0xa0   :  { %s3269_s19 = scalar_lea.hbm %s4094_s20, 512 }
  0xa1   :  { %p3270_p8 = scmp.ne.s32.totalorder %s4094_s20, %s3269_s19  ;;  %p3273_p9 = scmp.lt.u32.totalorder %s3269_s19, %s4094_s20 }
  0xa3   :  { %p3275_p10 = pnand %p3273_p9, %p3270_p8 }
  0xa5   :  { %3278 = shalt.err (!%p3275_p10)
}
  0xa6   :  { %s3279_s2 = scalar_lea.vmem %s40_s29, 512  ;;  %p3284_p12 = scmp.lt.s32.totalorder %s40_s29, %s40_s29 }
  0xa7   :  { %p3280_p11 = scmp.ne.s32.totalorder %s40_s29, %s3279_s2  ;;  %p3285_p13 = scmp.lt.s32.totalorder %s3279_s2, %s3279_s2 }
  0xa9   :  { %p3286_p0 = por %p3285_p13, %p3284_p12 }
  0xab   :  { %p3287_p1 = pnand %p3286_p0, %p3280_p11 }
  0xad   :  { %3290 = shalt.err (!%p3287_p1)
}
  0xae   :  { %s3544_s15 = smov 128   ;;  %s3545_s22 = smov 8  }
  0xaf   :  { %45 = dma.hbm_to_vmem [thread:$0]  %s4094_s20, 512, %s40_s29, [#allocation3], %s3544_s15, %s3544_s15, %s3545_s22  }
  0xb0   :  { %s3546_s25 = smov [#allocation7]   ;;  %s3547_s17 = smov [#allocation10]  }
  0xb1   :  { %s63_s26 = sshll.u32 %s3546_s25, 4  ;;  %s87_s18 = sshll.u32 %s3547_s17, 4  ;;  %s64_s26 = int_to_ptr.vmem [resolvable:$true] %s63_s26  ;;  %s88_s18 = int_to_ptr.vmem [resolvable:$true] %s87_s18 }
  0xb2   :  { %s4095_s27 = sld [smem:[#allocation45_spill]] }
  0xb8   :  { %s3291_s7 = scalar_lea.hbm %s4095_s27, 1024 }
  0xb9   :  { %p3292_p2 = scmp.ne.s32.totalorder %s4095_s27, %s3291_s7  ;;  %p3295_p3 = scmp.lt.u32.totalorder %s3291_s7, %s4095_s27 }
  0xbb   :  { %p3297_p4 = pnand %p3295_p3, %p3292_p2 }
  0xbd   :  { %3300 = shalt.err (!%p3297_p4)
}
  0xbe   :  { %s3301_s29 = scalar_lea.vmem %s64_s26, 1024  ;;  %p3306_p6 = scmp.lt.s32.totalorder %s64_s26, %s64_s26 }
  0xbf   :  { %p3302_p5 = scmp.ne.s32.totalorder %s64_s26, %s3301_s29  ;;  %p3307_p7 = scmp.lt.s32.totalorder %s3301_s29, %s3301_s29 }
  0xc1   :  { %p3308_p8 = por %p3307_p7, %p3306_p6 }
  0xc3   :  { %p3309_p9 = pnand %p3308_p8, %p3302_p5 }
  0xc5   :  { %3312 = shalt.err (!%p3309_p9)
}
  0xc6   :  { %69 = dma.hbm_to_vmem [thread:$0]  %s4095_s27, 1024, %s64_s26, [#allocation6], %s3534_s23, %s3534_s23, %s3535_s24  }
  0xc7   :  { %s3313_s2 = scalar_lea.hbm %s4068_s4, 1024 }
  0xc8   :  { %p3314_p10 = scmp.ne.s32.totalorder %s4068_s4, %s3313_s2  ;;  %p3317_p11 = scmp.lt.u32.totalorder %s3313_s2, %s4068_s4 }
  0xca   :  { %p3319_p12 = pnand %p3317_p11, %p3314_p10 }
  0xcc   :  { %3322 = shalt.err (!%p3319_p12)
}
  0xcd   :  { %s3323_s13 = scalar_lea.vmem %s88_s18, 1024  ;;  %p3328_p0 = scmp.lt.s32.totalorder %s88_s18, %s88_s18 }
  0xce   :  { %p3324_p13 = scmp.ne.s32.totalorder %s88_s18, %s3323_s13  ;;  %p3329_p1 = scmp.lt.s32.totalorder %s3323_s13, %s3323_s13 }
  0xd0   :  { %p3330_p2 = por %p3329_p1, %p3328_p0 }
  0xd2   :  { %p3331_p3 = pnand %p3330_p2, %p3324_p13 }
  0xd4   :  { %3334 = shalt.err (!%p3331_p3)
}
  0xd5   :  { %93 = dma.hbm_to_vmem [thread:$0]  %s4068_s4, 1024, %s88_s18, [#allocation9], %s3534_s23, %s3534_s23, %s3535_s24  }
  0xd6   :  { %s3548_s27 = smov [#allocation13]   ;;  %s3549_s28 = smov [#allocation16]  }
  0xd7   :  { %s109_s7 = sshll.u32 %s3548_s27, 4  ;;  %s131_s30 = sshll.u32 %s3549_s28, 4  ;;  %s110_s7 = int_to_ptr.vmem [resolvable:$true] %s109_s7  ;;  %s132_s30 = int_to_ptr.vmem [resolvable:$true] %s131_s30 }
  0xd8   :  { %s3335_s29 = scalar_lea.hbm %s4070_s6, 1024 }
  0xd9   :  { %p3336_p4 = scmp.ne.s32.totalorder %s4070_s6, %s3335_s29  ;;  %p3339_p5 = scmp.lt.u32.totalorder %s3335_s29, %s4070_s6 }
  0xdb   :  { %p3341_p6 = pnand %p3339_p5, %p3336_p4 }
  0xdd   :  { %3344 = shalt.err (!%p3341_p6)
}
  0xde   :  { %s3345_s4 = scalar_lea.vmem %s110_s7, 1024  ;;  %p3350_p8 = scmp.lt.s32.totalorder %s110_s7, %s110_s7 }
  0xdf   :  { %p3346_p7 = scmp.ne.s32.totalorder %s110_s7, %s3345_s4  ;;  %p3351_p9 = scmp.lt.s32.totalorder %s3345_s4, %s3345_s4 }
  0xe1   :  { %p3352_p10 = por %p3351_p9, %p3350_p8 }
  0xe3   :  { %p3353_p11 = pnand %p3352_p10, %p3346_p7 }
  0xe5   :  { %3356 = shalt.err (!%p3353_p11)
}
  0xe6   :  { %115 = dma.hbm_to_vmem [thread:$0]  %s4070_s6, 1024, %s110_s7, [#allocation12], %s3534_s23, %s3534_s23, %s3535_s24  }
  0xe7   :  { %s3357_s25 = scalar_lea.hbm %s4072_s8, 1024 }
  0xe8   :  { %p3358_p12 = scmp.ne.s32.totalorder %s4072_s8, %s3357_s25  ;;  %p3361_p13 = scmp.lt.u32.totalorder %s3357_s25, %s4072_s8 }
  0xea   :  { %p3363_p0 = pnand %p3361_p13, %p3358_p12 }
  0xec   :  { %3366 = shalt.err (!%p3363_p0)
}
  0xed   :  { %s3367_s27 = scalar_lea.vmem %s132_s30, 1024  ;;  %p3372_p2 = scmp.lt.s32.totalorder %s132_s30, %s132_s30 }
  0xee   :  { %p3368_p1 = scmp.ne.s32.totalorder %s132_s30, %s3367_s27  ;;  %p3373_p3 = scmp.lt.s32.totalorder %s3367_s27, %s3367_s27 }
  0xf0   :  { %p3374_p4 = por %p3373_p3, %p3372_p2 }
  0xf2   :  { %p3375_p5 = pnand %p3374_p4, %p3368_p1 }
  0xf4   :  { %3378 = shalt.err (!%p3375_p5)
}
  0xf5   :  { %137 = dma.hbm_to_vmem [thread:$0]  %s4072_s8, 1024, %s132_s30, [#allocation15], %s3534_s23, %s3534_s23, %s3535_s24  }
  0xf6   :  { %s3550_s28 = smov [#allocation19]   ;;  %s3551_s11 = smov [#allocation22]  }
  0xf7   :  { %s156_s19 = sshll.u32 %s3550_s28, 4  ;;  %s178_s29 = sshll.u32 %s3551_s11, 4  ;;  %s157_s19 = int_to_ptr.vmem [resolvable:$true] %s156_s19  ;;  %s179_s29 = int_to_ptr.vmem [resolvable:$true] %s178_s29 }
  0xf8   :  { %s3379_s21 = scalar_lea.hbm %s4074_s10, 16 }
  0xf9   :  { %p3380_p6 = scmp.ne.s32.totalorder %s4074_s10, %s3379_s21  ;;  %p3383_p7 = scmp.lt.u32.totalorder %s3379_s21, %s4074_s10 }
  0xfb   :  { %p3385_p8 = pnand %p3383_p7, %p3380_p6 }
  0xfd   :  { %3388 = shalt.err (!%p3385_p8)
}
  0xfe   :  { %s3389_s8 = scalar_lea.vmem %s157_s19, 16  ;;  %s3393_s30 = scalar_lea.vmem %s157_s19, 32 }
  0xff   :  { %p3390_p9 = scmp.ne.s32.totalorder %s157_s19, %s3389_s8  ;;  %p3394_p10 = scmp.lt.s32.totalorder %s157_s19, %s157_s19 }
 0x100   :  { %p3395_p11 = scmp.lt.s32.totalorder %s3393_s30, %s3389_s8 }
 0x102   :  { %p3396_p12 = por %p3395_p11, %p3394_p10 }
 0x104   :  { %p3397_p13 = pnand %p3396_p12, %p3390_p9 }
 0x106   :  { %3400 = shalt.err (!%p3397_p13)
}
 0x107   :  { %159 = dma.hbm_to_vmem [thread:$0]  %s4074_s10, 16, %s157_s19, [#allocation18]  }
 0x108   :  { %s3401_s13 = scalar_lea.hbm %s4076_s12, 16 }
 0x109   :  { %p3402_p0 = scmp.ne.s32.totalorder %s4076_s12, %s3401_s13  ;;  %p3405_p1 = scmp.lt.u32.totalorder %s3401_s13, %s4076_s12 }
 0x10b   :  { %p3407_p2 = pnand %p3405_p1, %p3402_p0 }
 0x10d   :  { %3410 = shalt.err (!%p3407_p2)
}
 0x10e   :  { %s3411_s7 = scalar_lea.vmem %s179_s29, 16  ;;  %s3415_s28 = scalar_lea.vmem %s179_s29, 32 }
 0x10f   :  { %p3412_p3 = scmp.ne.s32.totalorder %s179_s29, %s3411_s7  ;;  %p3416_p4 = scmp.lt.s32.totalorder %s179_s29, %s179_s29 }
 0x110   :  { %p3417_p5 = scmp.lt.s32.totalorder %s3415_s28, %s3411_s7 }
 0x112   :  { %p3418_p6 = por %p3417_p5, %p3416_p4 }
 0x114   :  { %p3419_p7 = pnand %p3418_p6, %p3412_p3 }
 0x116   :  { %3422 = shalt.err (!%p3419_p7)
}
 0x117   :  { %181 = dma.hbm_to_vmem [thread:$0]  %s4076_s12, 16, %s179_s29, [#allocation21]  }
 0x118   :  { %s3552_s11 = smov [#allocation25]   ;;  %s3553_s1 = smov [#allocation28]  }
 0x119   :  { %s199_s20 = sshll.u32 %s3552_s11, 4  ;;  %s221_s21 = sshll.u32 %s3553_s1, 4  ;;  %s200_s20 = int_to_ptr.vmem [resolvable:$true] %s199_s20  ;;  %s222_s21 = int_to_ptr.vmem [resolvable:$true] %s221_s21 }
 0x11a   :  { %s3423_s18 = scalar_lea.hbm %s4078_s14, 1024 }
 0x11b   :  { %p3424_p8 = scmp.ne.s32.totalorder %s4078_s14, %s3423_s18  ;;  %p3427_p9 = scmp.lt.u32.totalorder %s3423_s18, %s4078_s14 }
 0x11d   :  { %p3429_p10 = pnand %p3427_p9, %p3424_p8 }
 0x11f   :  { %3432 = shalt.err (!%p3429_p10)
}
 0x120   :  { %s3433_s12 = scalar_lea.vmem %s200_s20, 1024  ;;  %p3438_p12 = scmp.lt.s32.totalorder %s200_s20, %s200_s20 }
 0x121   :  { %p3434_p11 = scmp.ne.s32.totalorder %s200_s20, %s3433_s12  ;;  %p3439_p13 = scmp.lt.s32.totalorder %s3433_s12, %s3433_s12 }
 0x123   :  { %p3440_p0 = por %p3439_p13, %p3438_p12 }
 0x125   :  { %p3441_p1 = pnand %p3440_p0, %p3434_p11 }
 0x127   :  { %3444 = shalt.err (!%p3441_p1)
}
 0x128   :  { %205 = dma.hbm_to_vmem [thread:$0]  %s4078_s14, 1024, %s200_s20, [#allocation24], %s3534_s23, %s3534_s23, %s3535_s24  }
 0x129   :  { %s3445_s13 = scalar_lea.hbm %s4080_s16, 1024 }
 0x12a   :  { %p3446_p2 = scmp.ne.s32.totalorder %s4080_s16, %s3445_s13  ;;  %p3449_p3 = scmp.lt.u32.totalorder %s3445_s13, %s4080_s16 }
 0x12c   :  { %p3451_p4 = pnand %p3449_p3, %p3446_p2 }
 0x12e   :  { %3454 = shalt.err (!%p3451_p4)
}
 0x12f   :  { %s3455_s7 = scalar_lea.vmem %s222_s21, 1024  ;;  %p3460_p6 = scmp.lt.s32.totalorder %s222_s21, %s222_s21 }
 0x130   :  { %p3456_p5 = scmp.ne.s32.totalorder %s222_s21, %s3455_s7  ;;  %p3461_p7 = scmp.lt.s32.totalorder %s3455_s7, %s3455_s7 }
 0x132   :  { %p3462_p8 = por %p3461_p7, %p3460_p6 }
 0x134   :  { %p3463_p9 = pnand %p3462_p8, %p3456_p5 }
 0x136   :  { %3466 = shalt.err (!%p3463_p9)
}
 0x137   :  { %227 = dma.hbm_to_vmem [thread:$0]  %s4080_s16, 1024, %s222_s21, [#allocation27], %s3534_s23, %s3534_s23, %s3535_s24  }
 0x138   :  { %s3554_s10 = smov [#allocation29]   ;;  %s4096_s1 = sld [smem:[#allocation46_spill]] }
 0x139   :  { %s234_s19 = sshll.u32 %s3554_s10, 4  ;;  %s235_s19 = int_to_ptr.vmem [resolvable:$true] %s234_s19 }
 0x13e   :  { %s3467_s3 = scalar_lea.hbm %s4096_s1, 16 }
 0x13f   :  { %p3468_p10 = scmp.ne.s32.totalorder %s4096_s1, %s3467_s3  ;;  %p3471_p11 = scmp.lt.u32.totalorder %s3467_s3, %s4096_s1 }
 0x141   :  { %p3473_p12 = pnand %p3471_p11, %p3468_p10 }
 0x143   :  { %3476 = shalt.err (!%p3473_p12)
}
 0x144   :  { %s3477_s30 = scalar_lea.vmem %s235_s19, 16  ;;  %s3481_s16 = scalar_lea.vmem %s235_s19, 32 }
 0x145   :  { %p3478_p13 = scmp.ne.s32.totalorder %s235_s19, %s3477_s30  ;;  %p3482_p0 = scmp.lt.s32.totalorder %s235_s19, %s235_s19 }
 0x146   :  { %p3483_p1 = scmp.lt.s32.totalorder %s3481_s16, %s3477_s30 }
 0x148   :  { %p3484_p2 = por %p3483_p1, %p3482_p0 }
 0x14a   :  { %p3485_p3 = pnand %p3484_p2, %p3478_p13 }
 0x14c   :  { %3488 = shalt.err (!%p3485_p3)
}
 0x14d   :  { %237 = dma.hbm_to_vmem [thread:$0]  %s4096_s1, 16, %s235_s19, [#allocation30]  }
 0x14e   :  { %3511 = dma.done.wait [#allocation3], 512  }
 0x14f   :  { %3512 = vsyncadd [#allocation3], 4294966784 }
 0x150   :  { %3513 = dma.done.wait [#allocation6], 2048  }
 0x151   :  { %3514 = vsyncadd [#allocation6], 4294965248 }
 0x152   :  { %3515 = dma.done.wait [#allocation9], 2048  }
 0x153   :  { %3516 = vsyncadd [#allocation9], 4294965248 }
 0x154   :  { %3517 = dma.done.wait [#allocation12], 1040  }
 0x155   :  { %3518 = vsyncadd [#allocation12], 4294966256 }
 0x156   :  { %3519 = dma.done.wait [#allocation15], 1040  }
 0x157   :  { %3520 = vsyncadd [#allocation15], 4294966256 }
 0x158   :  { %3521 = dma.done.wait [#allocation18], 1040  }
 0x159   :  { %3522 = vsyncadd [#allocation18], 4294966256 }
 0x15a   :  { %3523 = dma.done.wait [#allocation21], 1040  }
 0x15b   :  { %3524 = vsyncadd [#allocation21], 4294966256 }
 0x15c   :  { %3525 = dma.done.wait [#allocation24], 2048  }
 0x15d   :  { %3526 = vsyncadd [#allocation24], 4294965248 }
 0x15e   :  { %3527 = dma.done.wait [#allocation27], 1040  }
 0x15f   :  { %3528 = vsyncadd [#allocation27], 4294966256 }
 0x160   :  { %3529 = dma.done.wait [#allocation30], 16  }
 0x161   :  { %3530 = vsyncadd [#allocation30], 4294967280  ;;  %v3903_v0 = vld [vmem:[#allocation5] sm:$0xff]   ;;  %v3905_v1 = vld [vmem:[#allocation5 + $0x8] sm:$0xff]   ;;  %s3555_s21 = smov [#allocation31]  }
 0x162   :  { %2582 = vmatprep.subr.bf16.mxu0 %v3903_v0  ;;  %v3910_v2 = vld [vmem:[#allocation5 + $0x10] sm:$0xff]   ;;  %v3914_v3 = vld [vmem:[#allocation5 + $0x18] sm:$0xff]   ;;  %v3916_v4 = vld [vmem:[#allocation2] sm:$0xff]  ;;  %s2291_s0 = sshll.u32 %s3555_s21, 4  ;;  %s2292_s0 = int_to_ptr.vmem [resolvable:$true] %s2291_s0 }
 0x163   :  { %2583 = vmatpush3.bf16.msra.mxu0 %v3903_v0  ;;  %v297_v5 = vunpack.c.l.s8.bf16 %v3916_v4  ;;  %v3013_v6 = vld [vmem:[#allocation10] sm:$0xff]   ;;  %v3014_v7 = vld [vmem:[#allocation10 + $0x8] sm:$0xff]   ;;  %v3015_v9 = vld [vmem:[#allocation10 + $0x10] sm:$0xff]   ;;  %v298_v18 = vunpack.c.h.s8.bf16 %v3916_v4  ;;  %s3489_s12 = scalar_lea.vmem %s2292_s0, 2048  ;;  %p3494_p5 = scmp.lt.s32.totalorder %s2292_s0, %s2292_s0 }
 0x164   :  { %2584 = vmatprep.subr.bf16.mxu0 %v3905_v1  ;;  %v3923_v8 = vld [vmem:[#allocation5 + $0x20] sm:$0xff]   ;;  %2614 = vmatprep.subr.bf16.mxu1 %v3013_v6  ;;  %v3926_v10 = vld [vmem:[#allocation5 + $0x28] sm:$0xff]   ;;  %v3016_v11 = vld [vmem:[#allocation10 + $0x18] sm:$0xff]   ;;  %p3490_p4 = scmp.ne.s32.totalorder %s2292_s0, %s3489_s12  ;;  %p3495_p6 = scmp.lt.s32.totalorder %s3489_s12, %s3489_s12 }
 0x165   :  { %2598 = vmatprep.mubr.bf16.mxu0 %v297_v5  ;;  %2615 = vmatpush3.bf16.msra.mxu1 %v3013_v6  ;;  %v3929_v12 = vld [vmem:[#allocation5 + $0x30] sm:$0xff]   ;;  %v3017_v13 = vld [vmem:[#allocation10 + $0x20] sm:$0xff]   ;;  %v3933_v14 = vld [vmem:[#allocation5 + $0x38] sm:$0xff]  }
 0x166   :  { %2616 = vmatprep.subr.bf16.mxu1 %v3014_v7  ;;  %v3018_v15 = vld [vmem:[#allocation10 + $0x28] sm:$0xff]   ;;  %v3019_v17 = vld [vmem:[#allocation10 + $0x30] sm:$0xff]   ;;  %v3954_v23 = vld [vmem:[#allocation2 + $0x18] sm:$0xff]  ;;  %p3496_p7 = por %p3495_p6, %p3494_p5 }
 0x167   :  { %2585 = vmatpush3.bf16.msra.mxu0 %v3905_v1  ;;  %v3937_v16 = vld [vmem:[#allocation2 + $0x8] sm:$0xff]  ;;  %v3946_v20 = vld [vmem:[#allocation2 + $0x10] sm:$0xff]  ;;  %v303_v25 = vunpack.c.l.s8.bf16 %v3954_v23  ;;  %v304_v26 = vunpack.c.h.s8.bf16 %v3954_v23  ;;  %v3020_v27 = vld [vmem:[#allocation10 + $0x38] sm:$0xff]  }
 0x168   :  { %2586 = vmatprep.subr.bf16.mxu0 %v3910_v2  ;;  %v299_v19 = vunpack.c.l.s8.bf16 %v3937_v16  ;;  %v300_v21 = vunpack.c.h.s8.bf16 %v3937_v16  ;;  %v301_v22 = vunpack.c.l.s8.bf16 %v3946_v20  ;;  %v302_v24 = vunpack.c.h.s8.bf16 %v3946_v20  ;;  %v3021_v28 = vld [vmem:[#allocation8] sm:$0xff]   ;;  %v3030_v30 = vld [vmem:[#allocation13 + $0x8] sm:$0xff]   ;;  %v3031_v31 = vld [vmem:[#allocation13 + $0x10] sm:$0xff]   ;;  %p3497_p8 = pnand %p3496_p7, %p3490_p4 }
 0x169   :  { %2617 = vmatpush3.bf16.msra.mxu1 %v3014_v7  ;;  %v3029_v29 = vld [vmem:[#allocation13] sm:$0xff]   ;;  %v3032_v32 = vld [vmem:[#allocation13 + $0x18] sm:$0xff]   ;;  %v3034_v34 = vld [vmem:[#allocation13 + $0x28] sm:$0xff]  }
 0x16a   :  { %2618 = vmatprep.subr.bf16.mxu1 %v3015_v9  ;;  %v3033_v33 = vld [vmem:[#allocation13 + $0x20] sm:$0xff]   ;;  %v3023_v44 = vld [vmem:[#allocation8 + $0x10] sm:$0xff]   ;;  %v3024_v49 = vld [vmem:[#allocation8 + $0x18] sm:$0xff]  }
 0x16b   :  { %2587 = vmatpush3.bf16.msra.mxu0 %v3910_v2  ;;  %v3022_v41 = vld [vmem:[#allocation8 + $0x8] sm:$0xff]   ;;  %v3025_v52 = vld [vmem:[#allocation8 + $0x20] sm:$0xff]   ;;  %v3027_v60 = vld [vmem:[#allocation8 + $0x30] sm:$0xff]  }
 0x16c   :  { %2588 = vmatprep.subr.bf16.mxu0 %v3914_v3  ;;  %v3026_v57 = vld [vmem:[#allocation8 + $0x28] sm:$0xff]   ;;  %v3028_v7 = vld [vmem:[#allocation8 + $0x38] sm:$0xff]  }
 0x16d   :  { %2619 = vmatpush3.bf16.msra.mxu1 %v3015_v9  ;;  %v3035_v9 = vld [vmem:[#allocation13 + $0x30] sm:$0xff]   ;;  %v3044_v4 = vld [vmem:[#allocation17 + $0x38] sm:$0xff]  }
 0x16e   :  { %2620 = vmatprep.subr.bf16.mxu1 %v3016_v11  ;;  %v3054_v16 = vld [vmem:[#allocation20 + $0x8] sm:$0xff]   ;;  %v3056_v20 = vld [vmem:[#allocation20 + $0x18] sm:$0xff]  }
 0x16f   :  { %2589 = vmatpush3.bf16.msra.mxu0 %v3914_v3  ;;  %v3058_v23 = vld [vmem:[#allocation20 + $0x28] sm:$0xff]  }
 0x170   :  { %2590 = vmatprep.subr.bf16.mxu0 %v3923_v8 }
 0x171   :  { %2621 = vmatpush3.bf16.msra.mxu1 %v3016_v11  ;;  %v2336_v11 = vld [vmem:[#allocation11] ss:$0 sm:$0xff] }
 0x172   :  { %2622 = vmatprep.subr.bf16.mxu1 %v3017_v13 }
 0x173   :  { %2591 = vmatpush3.bf16.msra.mxu0 %v3923_v8 }
 0x174   :  { %2592 = vmatprep.subr.bf16.mxu0 %v3926_v10 }
 0x175   :  { %2623 = vmatpush3.bf16.msra.mxu1 %v3017_v13 }
 0x176   :  { %2624 = vmatprep.subr.bf16.mxu1 %v3018_v15 }
 0x177   :  { %2593 = vmatpush3.bf16.msra.mxu0 %v3926_v10 }
 0x178   :  { %2594 = vmatprep.subr.bf16.mxu0 %v3929_v12 }
 0x179   :  { %2625 = vmatpush3.bf16.msra.mxu1 %v3018_v15 }
 0x17a   :  { %2626 = vmatprep.subr.bf16.mxu1 %v3019_v17 }
 0x17b   :  { %2595 = vmatpush3.bf16.msra.mxu0 %v3929_v12 }
 0x17c   :  { %2596 = vmatprep.subr.bf16.mxu0 %v3933_v14 }
 0x17d   :  { %2627 = vmatpush3.bf16.msra.mxu1 %v3019_v17 }
 0x17e   :  { %2628 = vmatprep.subr.bf16.mxu1 %v3020_v27 }
 0x17f   :  { %2597 = vmatpush3.bf16.msra.mxu0 %v3933_v14 }
 0x180   :  { %2678 = vmatprep.subr.bf16.mxu0 %v3029_v29 }
 0x181   :  { %2629 = vmatpush3.bf16.msra.mxu1 %v3020_v27 }
 0x182   :  { %2599 = vmatmul.mubr.bf16.vlgmr.msra.gmra.mrb[0].mxu0 %v298_v18  ;;  %2646 = vmatprep.subr.bf16.mxu1 %v3021_v28 }
 0x183   :  { %2602 = vmatprep.mubr.bf16.mxu0 %v299_v19  ;;  %2679 = vmatpush3.bf16.msra.mxu0 %v3029_v29 }
 0x184   :  { %2680 = vmatprep.subr.bf16.mxu0 %v3030_v30 }
 0x187   :  { %2681 = vmatpush3.bf16.msra.mxu0 %v3030_v30 }
 0x188   :  { %2682 = vmatprep.subr.bf16.mxu0 %v3031_v31 }
 0x18a   :  { %2603 = vmatmul.mubr.bf16.gmra.mrb[4].mxu0 %v300_v21 }
 0x18b   :  { %2606 = vmatprep.mubr.bf16.mxu0 %v301_v22  ;;  %2683 = vmatpush3.bf16.msra.mxu0 %v3031_v31 }
 0x18c   :  { %2684 = vmatprep.subr.bf16.mxu0 %v3032_v32 }
 0x18f   :  { %2685 = vmatpush3.bf16.msra.mxu0 %v3032_v32 }
 0x190   :  { %2686 = vmatprep.subr.bf16.mxu0 %v3033_v33 }
 0x192   :  { %2607 = vmatmul.mubr.bf16.gmra.mrb[8].mxu0 %v302_v24 }
 0x193   :  { %2610 = vmatprep.mubr.bf16.mxu0 %v303_v25  ;;  %2687 = vmatpush3.bf16.msra.mxu0 %v3033_v33 }
 0x194   :  { %2688 = vmatprep.subr.bf16.mxu0 %v3034_v34 }
 0x197   :  { %2689 = vmatpush3.bf16.msra.mxu0 %v3034_v34 }
 0x198   :  { %2690 = vmatprep.subr.bf16.mxu0 %v3035_v9 }
 0x19a   :  { %2611 = vmatmul.mubr.bf16.gmra.mrb[12].mxu0 %v304_v26 }
 0x19b   :  { %2691 = vmatpush3.bf16.msra.mxu0 %v3035_v9 }
 0x255   :  { %v2600_v35 = vpop.f32.mrb[0].mxu0 }
 0x256   :  { %v403_v36 = vpop.f32.mrb[1].mxu0 }
 0x257   :  { %v2601_v37 = vpop.f32.mrb[2].mxu0 }
 0x258   :  { %v483_v38 = vpack.c.bf16 %v2601_v37, %v2600_v35  ;;  %v406_v39 = vpop.f32.mrb[3].mxu0 }
 0x259   :  { %v482_v40 = vpack.c.bf16 %v406_v39, %v403_v36 }
 0x25b   :  { %2630 = vmatprep.mubr.bf16.mxu1 %v482_v40 }
 0x25c   :  { %2631 = vmatmul.mubr.bf16.vlgmr.msra.gmra.mrb[0].mxu1 %v483_v38 }
 0x25d   :  { %v2604_v42 = vpop.f32.mrb[4].mxu0  ;;  %2647 = vmatpush3.bf16.msra.mxu1 %v3021_v28 }
 0x25e   :  { %v419_v43 = vpop.f32.mrb[5].mxu0  ;;  %2648 = vmatprep.subr.bf16.mxu1 %v3022_v41 }
 0x25f   :  { %v2605_v45 = vpop.f32.mrb[6].mxu0 }
 0x260   :  { %v485_v46 = vpack.c.bf16 %v2605_v45, %v2604_v42  ;;  %v422_v47 = vpop.f32.mrb[7].mxu0 }
 0x261   :  { %v484_v48 = vpack.c.bf16 %v422_v47, %v419_v43  ;;  %2649 = vmatpush3.bf16.msra.mxu1 %v3022_v41 }
 0x262   :  { %2650 = vmatprep.subr.bf16.mxu1 %v3023_v44 }
 0x263   :  { %2634 = vmatprep.mubr.bf16.mxu1 %v484_v48 }
 0x264   :  { %2635 = vmatmul.mubr.bf16.gmra.mrb[4].mxu1 %v485_v46 }
 0x265   :  { %v2608_v50 = vpop.f32.mrb[8].mxu0  ;;  %2651 = vmatpush3.bf16.msra.mxu1 %v3023_v44 }
 0x266   :  { %v435_v51 = vpop.f32.mrb[9].mxu0  ;;  %2652 = vmatprep.subr.bf16.mxu1 %v3024_v49 }
 0x267   :  { %v2609_v53 = vpop.f32.mrb[10].mxu0 }
 0x268   :  { %v487_v54 = vpack.c.bf16 %v2609_v53, %v2608_v50  ;;  %v438_v55 = vpop.f32.mrb[11].mxu0 }
 0x269   :  { %v486_v56 = vpack.c.bf16 %v438_v55, %v435_v51  ;;  %2653 = vmatpush3.bf16.msra.mxu1 %v3024_v49 }
 0x26a   :  { %2654 = vmatprep.subr.bf16.mxu1 %v3025_v52 }
 0x26b   :  { %2638 = vmatprep.mubr.bf16.mxu1 %v486_v56 }
 0x26c   :  { %2639 = vmatmul.mubr.bf16.gmra.mrb[8].mxu1 %v487_v54 }
 0x26d   :  { %v2612_v58 = vpop.f32.mrb[12].mxu0  ;;  %2655 = vmatpush3.bf16.msra.mxu1 %v3025_v52 }
 0x26e   :  { %v451_v59 = vpop.f32.mrb[13].mxu0  ;;  %2656 = vmatprep.subr.bf16.mxu1 %v3026_v57 }
 0x26f   :  { %v2613_v61 = vpop.f32.mrb[14].mxu0 }
 0x270   :  { %v489_v62 = vpack.c.bf16 %v2613_v61, %v2612_v58  ;;  %v454_v63 = vpop.f32.mrb[15].mxu0 }
 0x271   :  { %v488_v6 = vpack.c.bf16 %v454_v63, %v451_v59  ;;  %2657 = vmatpush3.bf16.msra.mxu1 %v3026_v57 }
 0x272   :  { %2658 = vmatprep.subr.bf16.mxu1 %v3027_v60 }
 0x273   :  { %2642 = vmatprep.mubr.bf16.mxu1 %v488_v6 }
 0x274   :  { %2643 = vmatmul.mubr.bf16.gmra.mrb[12].mxu1 %v489_v62 }
 0x275   :  { %2659 = vmatpush3.bf16.msra.mxu1 %v3027_v60  ;;  %2662 = vmatprep.mubr.bf16.mxu1 %v3903_v0  ;;  %v3036_v0 = vld [vmem:[#allocation13 + $0x38] sm:$0xff]  }
 0x276   :  { %2660 = vmatprep.subr.bf16.mxu1 %v3028_v7  ;;  %2692 = vmatprep.subr.bf16.mxu0 %v3036_v0 }
 0x277   :  { %2693 = vmatpush3.bf16.msra.mxu0 %v3036_v0 }
 0x279   :  { %2661 = vmatpush3.bf16.msra.mxu1 %v3028_v7 }
 0x27c   :  { %2663 = vmatmul.mubr.bf16.vlgmr.msra.gmra.mrb[0].mxu1 %v3905_v1 }
 0x27d   :  { %2666 = vmatprep.mubr.bf16.mxu1 %v3910_v2 }
 0x284   :  { %2667 = vmatmul.mubr.bf16.gmra.mrb[4].mxu1 %v3914_v3 }
 0x285   :  { %2670 = vmatprep.mubr.bf16.mxu1 %v3923_v8 }
 0x28c   :  { %2671 = vmatmul.mubr.bf16.gmra.mrb[8].mxu1 %v3926_v10 }
 0x28d   :  { %2674 = vmatprep.mubr.bf16.mxu1 %v3929_v12 }
 0x294   :  { %2675 = vmatmul.mubr.bf16.gmra.mrb[12].mxu1 %v3933_v14 }
 0x34f   :  { %v2664_v1 = vpop.f32.mrb[0].mxu1 }
 0x350   :  { %v805_v13 = vadd.f32 %v2664_v1, %v2336_v11  ;;  %v733_v2 = vpop.f32.mrb[1].mxu1 }
 0x351   :  { %v803_v15 = vadd.f32 %v2336_v11, %v733_v2  ;;  %v2665_v3 = vpop.f32.mrb[2].mxu1 }
 0x352   :  { %v806_v17 = vadd.f32 %v2665_v3, %v2336_v11  ;;  %v736_v8 = vpop.f32.mrb[3].mxu1  ;;  %v821_v10 = vmax.f32 %v805_v13, 0.0 }
 0x353   :  { %v804_v27 = vadd.f32 %v2336_v11, %v736_v8  ;;  %v819_v12 = vmax.f32 %v803_v15, 0.0  ;;  %v3038_v8 = vld [vmem:[#allocation17 + $0x8] sm:$0xff]  }
 0x354   :  { %v822_v28 = vmax.f32 %v806_v17, 0.0  ;;  %v3037_v17 = vld [vmem:[#allocation17] sm:$0xff]  }
 0x355   :  { %v820_v29 = vmax.f32 %v804_v27, 0.0  ;;  %2742 = vmatprep.subr.bf16.mxu1 %v3037_v17  ;;  %v3039_v27 = vld [vmem:[#allocation17 + $0x10] sm:$0xff]  }
 0x356   :  { %v836_v14 = vpack.c.bf16 %v822_v28, %v821_v10  ;;  %2743 = vmatpush3.bf16.msra.mxu1 %v3037_v17  ;;  %v3041_v10 = vld [vmem:[#allocation17 + $0x20] sm:$0xff]   ;;  %v3042_v28 = vld [vmem:[#allocation17 + $0x28] sm:$0xff]  }
 0x357   :  { %v835_v30 = vpack.c.bf16 %v820_v29, %v819_v12  ;;  %v2668_v31 = vpop.f32.mrb[4].mxu1  ;;  %2744 = vmatprep.subr.bf16.mxu1 %v3038_v8  ;;  %v3043_v12 = vld [vmem:[#allocation17 + $0x30] sm:$0xff]   ;;  %v2337_v29 = vld [vmem:[#allocation14] ss:$0 sm:$0xff] }
 0x358   :  { %v809_v32 = vadd.f32 %v2668_v31, %v2336_v11  ;;  %v749_v33 = vpop.f32.mrb[5].mxu1 }
 0x359   :  { %v807_v34 = vadd.f32 %v2336_v11, %v749_v33  ;;  %v2669_v35 = vpop.f32.mrb[6].mxu1  ;;  %2694 = vmatprep.mubr.bf16.mxu0 %v835_v30 }
 0x35a   :  { %v810_v36 = vadd.f32 %v2669_v35, %v2336_v11  ;;  %v752_v37 = vpop.f32.mrb[7].mxu1  ;;  %2695 = vmatmul.mubr.bf16.vlgmr.msra.gmra.mrb[16].mxu0 %v836_v14  ;;  %v825_v39 = vmax.f32 %v809_v32, 0.0  ;;  %2745 = vmatpush3.bf16.msra.mxu1 %v3038_v8  ;;  %v3047_v8 = vld [vmem:[#allocation16 + $0x10] sm:$0xff]  }
 0x35b   :  { %v808_v38 = vadd.f32 %v2336_v11, %v752_v37  ;;  %v823_v41 = vmax.f32 %v807_v34, 0.0  ;;  %2746 = vmatprep.subr.bf16.mxu1 %v3039_v27 }
 0x35c   :  { %v826_v40 = vmax.f32 %v810_v36, 0.0 }
 0x35d   :  { %v824_v42 = vmax.f32 %v808_v38, 0.0 }
 0x35e   :  { %v838_v43 = vpack.c.bf16 %v826_v40, %v825_v39  ;;  %2747 = vmatpush3.bf16.msra.mxu1 %v3039_v27 }
 0x35f   :  { %v837_v44 = vpack.c.bf16 %v824_v42, %v823_v41  ;;  %v2672_v45 = vpop.f32.mrb[8].mxu1 }
 0x360   :  { %v813_v46 = vadd.f32 %v2672_v45, %v2336_v11  ;;  %v765_v47 = vpop.f32.mrb[9].mxu1 }
 0x361   :  { %v811_v48 = vadd.f32 %v2336_v11, %v765_v47  ;;  %v2673_v49 = vpop.f32.mrb[10].mxu1  ;;  %2698 = vmatprep.mubr.bf16.mxu0 %v837_v44 }
 0x362   :  { %v814_v50 = vadd.f32 %v2673_v49, %v2336_v11  ;;  %v768_v51 = vpop.f32.mrb[11].mxu1  ;;  %2699 = vmatmul.mubr.bf16.gmra.mrb[20].mxu0 %v838_v43  ;;  %v829_v53 = vmax.f32 %v813_v46, 0.0 }
 0x363   :  { %v812_v52 = vadd.f32 %v2336_v11, %v768_v51  ;;  %v827_v55 = vmax.f32 %v811_v48, 0.0 }
 0x364   :  { %v830_v54 = vmax.f32 %v814_v50, 0.0 }
 0x365   :  { %v828_v56 = vmax.f32 %v812_v52, 0.0 }
 0x366   :  { %v840_v57 = vpack.c.bf16 %v830_v54, %v829_v53 }
 0x367   :  { %v839_v58 = vpack.c.bf16 %v828_v56, %v827_v55  ;;  %v2676_v59 = vpop.f32.mrb[12].mxu1 }
 0x368   :  { %v817_v60 = vadd.f32 %v2676_v59, %v2336_v11  ;;  %v781_v61 = vpop.f32.mrb[13].mxu1 }
 0x369   :  { %v815_v62 = vadd.f32 %v2336_v11, %v781_v61  ;;  %v2677_v63 = vpop.f32.mrb[14].mxu1  ;;  %2702 = vmatprep.mubr.bf16.mxu0 %v839_v58 }
 0x36a   :  { %v818_v6 = vadd.f32 %v2677_v63, %v2336_v11  ;;  %v784_v7 = vpop.f32.mrb[15].mxu1  ;;  %2703 = vmatmul.mubr.bf16.gmra.mrb[24].mxu0 %v840_v57  ;;  %v833_v0 = vmax.f32 %v817_v60, 0.0 }
 0x36b   :  { %v816_v9 = vadd.f32 %v2336_v11, %v784_v7  ;;  %v831_v13 = vmax.f32 %v815_v62, 0.0  ;;  %v3040_v11 = vld [vmem:[#allocation17 + $0x18] sm:$0xff]  }
 0x36c   :  { %v834_v1 = vmax.f32 %v818_v6, 0.0  ;;  %2748 = vmatprep.subr.bf16.mxu1 %v3040_v11 }
 0x36d   :  { %v832_v2 = vmax.f32 %v816_v9, 0.0  ;;  %2749 = vmatpush3.bf16.msra.mxu1 %v3040_v11 }
 0x36e   :  { %v842_v15 = vpack.c.bf16 %v834_v1, %v833_v0  ;;  %2750 = vmatprep.subr.bf16.mxu1 %v3041_v10 }
 0x36f   :  { %v841_v3 = vpack.c.bf16 %v832_v2, %v831_v13 }
 0x371   :  { %2706 = vmatprep.mubr.bf16.mxu0 %v841_v3  ;;  %2751 = vmatpush3.bf16.msra.mxu1 %v3041_v10 }
 0x372   :  { %2707 = vmatmul.mubr.bf16.gmra.mrb[28].mxu0 %v842_v15  ;;  %2752 = vmatprep.subr.bf16.mxu1 %v3042_v28  ;;  %v3046_v15 = vld [vmem:[#allocation16 + $0x8] sm:$0xff]  }
 0x373   :  { %2726 = vmatprep.mubr.bf16.mxu0 %v297_v5 }
 0x375   :  { %2753 = vmatpush3.bf16.msra.mxu1 %v3042_v28 }
 0x376   :  { %2754 = vmatprep.subr.bf16.mxu1 %v3043_v12 }
 0x379   :  { %2755 = vmatpush3.bf16.msra.mxu1 %v3043_v12  ;;  %v3048_v12 = vld [vmem:[#allocation16 + $0x18] sm:$0xff]  }
 0x37a   :  { %2756 = vmatprep.subr.bf16.mxu1 %v3044_v4 }
 0x37d   :  { %2757 = vmatpush3.bf16.msra.mxu1 %v3044_v4 }
 0x42d   :  { %v2696_v5 = vpop.f32.mrb[16].mxu0 }
 0x42e   :  { %v948_v14 = vpop.f32.mrb[17].mxu0  ;;  %v957_v31 = vadd.f32 %v2696_v5, %v2337_v29 }
 0x42f   :  { %v2697_v30 = vpop.f32.mrb[18].mxu0  ;;  %v949_v34 = vadd.f32 %v2337_v29, %v948_v14  ;;  %v3049_v14 = vld [vmem:[#allocation16 + $0x20] sm:$0xff]  }
 0x430   :  { %v960_v32 = vadd.f32 %v2697_v30, %v2337_v29  ;;  %v951_v33 = vpop.f32.mrb[19].mxu0 }
 0x431   :  { %v952_v35 = vadd.f32 %v2337_v29, %v951_v33 }
 0x432   :  { %v3977_v36 = vpack.c.bf16 %v960_v32, %v957_v31 }
 0x433   :  { %v3979_v37 = vpack.c.bf16 %v952_v35, %v949_v34  ;;  %v3050_v34 = vld [vmem:[#allocation16 + $0x28] sm:$0xff]  }
 0x435   :  { %v2700_v38 = vpop.f32.mrb[20].mxu0  ;;  %2710 = vmatprep.subr.bf16.mxu0 %v3979_v37 }
 0x436   :  { %v964_v39 = vpop.f32.mrb[21].mxu0  ;;  %2711 = vmatpush3.bf16.msra.mxu0 %v3979_v37  ;;  %v973_v41 = vadd.f32 %v2700_v38, %v2337_v29 }
 0x437   :  { %v2701_v40 = vpop.f32.mrb[22].mxu0  ;;  %2712 = vmatprep.subr.bf16.mxu0 %v3977_v36  ;;  %v965_v44 = vadd.f32 %v2337_v29, %v964_v39  ;;  %v3051_v39 = vld [vmem:[#allocation16 + $0x30] sm:$0xff]  }
 0x438   :  { %v976_v42 = vadd.f32 %v2701_v40, %v2337_v29  ;;  %v967_v43 = vpop.f32.mrb[23].mxu0 }
 0x439   :  { %v968_v45 = vadd.f32 %v2337_v29, %v967_v43 }
 0x43a   :  { %v3984_v46 = vpack.c.bf16 %v976_v42, %v973_v41  ;;  %2713 = vmatpush3.bf16.msra.mxu0 %v3977_v36 }
 0x43b   :  { %v3987_v47 = vpack.c.bf16 %v968_v45, %v965_v44  ;;  %v3052_v44 = vld [vmem:[#allocation16 + $0x38] sm:$0xff]  }
 0x43c   :  { %v3059_v45 = vld [vmem:[#allocation20 + $0x30] sm:$0xff]  }
 0x43d   :  { %v2704_v48 = vpop.f32.mrb[24].mxu0  ;;  %2714 = vmatprep.subr.bf16.mxu0 %v3987_v47 }
 0x43e   :  { %v980_v49 = vpop.f32.mrb[25].mxu0  ;;  %2715 = vmatpush3.bf16.msra.mxu0 %v3987_v47  ;;  %v989_v51 = vadd.f32 %v2704_v48, %v2337_v29  ;;  %v3061_v48 = vld [vmem:[#allocation25] sm:$0xff]  }
 0x43f   :  { %v2705_v50 = vpop.f32.mrb[26].mxu0  ;;  %2716 = vmatprep.subr.bf16.mxu0 %v3984_v46  ;;  %v981_v54 = vadd.f32 %v2337_v29, %v980_v49 }
 0x440   :  { %v992_v52 = vadd.f32 %v2705_v50, %v2337_v29  ;;  %v983_v53 = vpop.f32.mrb[27].mxu0 }
 0x441   :  { %v984_v55 = vadd.f32 %v2337_v29, %v983_v53 }
 0x442   :  { %v3992_v56 = vpack.c.bf16 %v992_v52, %v989_v51  ;;  %2717 = vmatpush3.bf16.msra.mxu0 %v3984_v46 }
 0x443   :  { %v3995_v57 = vpack.c.bf16 %v984_v55, %v981_v54 }
 0x445   :  { %v2708_v58 = vpop.f32.mrb[28].mxu0  ;;  %2718 = vmatprep.subr.bf16.mxu0 %v3995_v57 }
 0x446   :  { %v996_v59 = vpop.f32.mrb[29].mxu0  ;;  %2719 = vmatpush3.bf16.msra.mxu0 %v3995_v57  ;;  %v1005_v61 = vadd.f32 %v2708_v58, %v2337_v29 }
 0x447   :  { %v2709_v60 = vpop.f32.mrb[30].mxu0  ;;  %2720 = vmatprep.subr.bf16.mxu0 %v3992_v56  ;;  %v997_v6 = vadd.f32 %v2337_v29, %v996_v59 }
 0x448   :  { %v1008_v62 = vadd.f32 %v2709_v60, %v2337_v29  ;;  %v999_v63 = vpop.f32.mrb[31].mxu0 }
 0x449   :  { %v1000_v7 = vadd.f32 %v2337_v29, %v999_v63 }
 0x44a   :  { %v4000_v9 = vpack.c.bf16 %v1008_v62, %v1005_v61  ;;  %2721 = vmatpush3.bf16.msra.mxu0 %v3992_v56 }
 0x44b   :  { %v4003_v0 = vpack.c.bf16 %v1000_v7, %v997_v6  ;;  %v3062_v6 = vld [vmem:[#allocation25 + $0x8] sm:$0xff]  }
 0x44d   :  { %2722 = vmatprep.subr.bf16.mxu0 %v4003_v0 }
 0x44e   :  { %2723 = vmatpush3.bf16.msra.mxu0 %v4003_v0 }
 0x44f   :  { %2724 = vmatprep.subr.bf16.mxu0 %v4000_v9 }
 0x452   :  { %2725 = vmatpush3.bf16.msra.mxu0 %v4000_v9 }
 0x455   :  { %2727 = vmatmul.mubr.bf16.vlgmr.msra.gmra.mrb[32].mxu0 %v298_v18  ;;  %v3045_v18 = vld [vmem:[#allocation16] sm:$0xff]  }
 0x456   :  { %2730 = vmatprep.mubr.bf16.mxu0 %v299_v19  ;;  %2774 = vmatprep.subr.bf16.mxu1 %v3045_v18  ;;  %v3053_v19 = vld [vmem:[#allocation20] sm:$0xff]  }
 0x457   :  { %2806 = vmatprep.subr.bf16.mxu0 %v3053_v19 }
 0x458   :  { %2807 = vmatpush3.bf16.msra.mxu0 %v3053_v19 }
 0x459   :  { %2808 = vmatprep.subr.bf16.mxu0 %v3054_v16 }
 0x45c   :  { %2809 = vmatpush3.bf16.msra.mxu0 %v3054_v16 }
 0x45d   :  { %2731 = vmatmul.mubr.bf16.gmra.mrb[36].mxu0 %v300_v21  ;;  %v3055_v21 = vld [vmem:[#allocation20 + $0x10] sm:$0xff]  }
 0x45e   :  { %2734 = vmatprep.mubr.bf16.mxu0 %v301_v22  ;;  %2810 = vmatprep.subr.bf16.mxu0 %v3055_v21  ;;  %v3057_v22 = vld [vmem:[#allocation20 + $0x20] sm:$0xff]  }
 0x460   :  { %2811 = vmatpush3.bf16.msra.mxu0 %v3055_v21  ;;  %v3063_v21 = vld [vmem:[#allocation25 + $0x10] sm:$0xff]  }
 0x461   :  { %2812 = vmatprep.subr.bf16.mxu0 %v3056_v20 }
 0x464   :  { %2813 = vmatpush3.bf16.msra.mxu0 %v3056_v20 }
 0x465   :  { %2735 = vmatmul.mubr.bf16.gmra.mrb[40].mxu0 %v302_v24  ;;  %2814 = vmatprep.subr.bf16.mxu0 %v3057_v22 }
 0x466   :  { %2738 = vmatprep.mubr.bf16.mxu0 %v303_v25 }
 0x468   :  { %2815 = vmatpush3.bf16.msra.mxu0 %v3057_v22 }
 0x469   :  { %2816 = vmatprep.subr.bf16.mxu0 %v3058_v23 }
 0x46c   :  { %2817 = vmatpush3.bf16.msra.mxu0 %v3058_v23 }
 0x46d   :  { %2739 = vmatmul.mubr.bf16.gmra.mrb[44].mxu0 %v304_v26  ;;  %2818 = vmatprep.subr.bf16.mxu0 %v3059_v45 }
 0x470   :  { %2819 = vmatpush3.bf16.msra.mxu0 %v3059_v45 }
 0x528   :  { %v2728_v24 = vpop.f32.mrb[32].mxu0 }
 0x529   :  { %v1053_v25 = vpop.f32.mrb[33].mxu0 }
 0x52a   :  { %v2729_v26 = vpop.f32.mrb[34].mxu0 }
 0x52b   :  { %v1133_v1 = vpack.c.bf16 %v2729_v26, %v2728_v24  ;;  %v1056_v13 = vpop.f32.mrb[35].mxu0 }
 0x52c   :  { %v1132_v2 = vpack.c.bf16 %v1056_v13, %v1053_v25  ;;  %v3064_v13 = vld [vmem:[#allocation25 + $0x18] sm:$0xff]  }
 0x52e   :  { %2758 = vmatprep.mubr.bf16.mxu1 %v1132_v2 }
 0x52f   :  { %2759 = vmatmul.mubr.bf16.vlgmr.msra.gmra.mrb[16].mxu1 %v1133_v1 }
 0x530   :  { %v2732_v3 = vpop.f32.mrb[36].mxu0  ;;  %2775 = vmatpush3.bf16.msra.mxu1 %v3045_v18 }
 0x531   :  { %v1069_v17 = vpop.f32.mrb[37].mxu0  ;;  %2776 = vmatprep.subr.bf16.mxu1 %v3046_v15 }
 0x532   :  { %v2733_v27 = vpop.f32.mrb[38].mxu0 }
 0x533   :  { %v1135_v11 = vpack.c.bf16 %v2733_v27, %v2732_v3  ;;  %v1072_v10 = vpop.f32.mrb[39].mxu0 }
 0x534   :  { %v1134_v28 = vpack.c.bf16 %v1072_v10, %v1069_v17  ;;  %2777 = vmatpush3.bf16.msra.mxu1 %v3046_v15  ;;  %v3065_v10 = vld [vmem:[#allocation25 + $0x20] sm:$0xff]  }
 0x535   :  { %2778 = vmatprep.subr.bf16.mxu1 %v3047_v8 }
 0x536   :  { %2762 = vmatprep.mubr.bf16.mxu1 %v1134_v28 }
 0x537   :  { %2763 = vmatmul.mubr.bf16.gmra.mrb[20].mxu1 %v1135_v11 }
 0x538   :  { %v2736_v5 = vpop.f32.mrb[40].mxu0  ;;  %2779 = vmatpush3.bf16.msra.mxu1 %v3047_v8 }
 0x539   :  { %v1085_v29 = vpop.f32.mrb[41].mxu0  ;;  %2780 = vmatprep.subr.bf16.mxu1 %v3048_v12 }
 0x53a   :  { %v2737_v30 = vpop.f32.mrb[42].mxu0 }
 0x53b   :  { %v1137_v31 = vpack.c.bf16 %v2737_v30, %v2736_v5  ;;  %v1088_v32 = vpop.f32.mrb[43].mxu0 }
 0x53c   :  { %v1136_v33 = vpack.c.bf16 %v1088_v32, %v1085_v29  ;;  %2781 = vmatpush3.bf16.msra.mxu1 %v3048_v12  ;;  %v3066_v32 = vld [vmem:[#allocation25 + $0x28] sm:$0xff]  }
 0x53d   :  { %2782 = vmatprep.subr.bf16.mxu1 %v3049_v14 }
 0x53e   :  { %2766 = vmatprep.mubr.bf16.mxu1 %v1136_v33 }
 0x53f   :  { %2767 = vmatmul.mubr.bf16.gmra.mrb[24].mxu1 %v1137_v31 }
 0x540   :  { %v2740_v35 = vpop.f32.mrb[44].mxu0  ;;  %2783 = vmatpush3.bf16.msra.mxu1 %v3049_v14 }
 0x541   :  { %v1101_v38 = vpop.f32.mrb[45].mxu0  ;;  %2784 = vmatprep.subr.bf16.mxu1 %v3050_v34 }
 0x542   :  { %v2741_v40 = vpop.f32.mrb[46].mxu0 }
 0x543   :  { %v1139_v41 = vpack.c.bf16 %v2741_v40, %v2740_v35  ;;  %v1104_v42 = vpop.f32.mrb[47].mxu0 }
 0x544   :  { %v1138_v43 = vpack.c.bf16 %v1104_v42, %v1101_v38  ;;  %2785 = vmatpush3.bf16.msra.mxu1 %v3050_v34  ;;  %v3067_v42 = vld [vmem:[#allocation25 + $0x30] sm:$0xff]  }
 0x545   :  { %2786 = vmatprep.subr.bf16.mxu1 %v3051_v39 }
 0x546   :  { %2770 = vmatprep.mubr.bf16.mxu1 %v1138_v43 }
 0x547   :  { %2771 = vmatmul.mubr.bf16.gmra.mrb[28].mxu1 %v1139_v41 }
 0x548   :  { %2787 = vmatpush3.bf16.msra.mxu1 %v3051_v39  ;;  %2790 = vmatprep.mubr.bf16.mxu1 %v3979_v37  ;;  %v3060_v37 = vld [vmem:[#allocation20 + $0x38] sm:$0xff]  }
 0x549   :  { %2788 = vmatprep.subr.bf16.mxu1 %v3052_v44  ;;  %2820 = vmatprep.subr.bf16.mxu0 %v3060_v37 }
 0x54a   :  { %2821 = vmatpush3.bf16.msra.mxu0 %v3060_v37 }
 0x54b   :  { %2838 = vmatprep.subr.bf16.mxu0 %v3061_v48 }
 0x54c   :  { %2789 = vmatpush3.bf16.msra.mxu1 %v3052_v44 }
 0x54f   :  { %2791 = vmatmul.mubr.bf16.vlgmr.msra.gmra.mrb[16].mxu1 %v3977_v36  ;;  %v4031_v36 = vld [vmem:[#allocation19] ss:$0 sm:$0xff] }
 0x550   :  { %2794 = vmatprep.mubr.bf16.mxu1 %v3987_v47 }
 0x557   :  { %2795 = vmatmul.mubr.bf16.gmra.mrb[20].mxu1 %v3984_v46 }
 0x558   :  { %2798 = vmatprep.mubr.bf16.mxu1 %v3995_v57 }
 0x55f   :  { %2799 = vmatmul.mubr.bf16.gmra.mrb[24].mxu1 %v3992_v56 }
 0x560   :  { %2802 = vmatprep.mubr.bf16.mxu1 %v4003_v0 }
 0x567   :  { %2803 = vmatmul.mubr.bf16.gmra.mrb[28].mxu1 %v4000_v9 }
 0x622   :  { %v2792_v47 = vpop.f32.mrb[16].mxu1 }
 0x623   :  { %v1455_v46 = vadd.f32 %v2792_v47, %v4031_v36  ;;  %v1383_v49 = vpop.f32.mrb[17].mxu1  ;;  %v3068_v47 = vld [vmem:[#allocation25 + $0x38] sm:$0xff]  }
 0x624   :  { %v1453_v50 = vadd.f32 %v4031_v36, %v1383_v49  ;;  %v2793_v51 = vpop.f32.mrb[18].mxu1  ;;  %v3073_v49 = vld [vmem:[#allocation7 + $0x10] sm:$0xff]  }
 0x625   :  { %v1456_v52 = vadd.f32 %v2793_v51, %v4031_v36  ;;  %v1386_v53 = vpop.f32.mrb[19].mxu1  ;;  %v1471_v55 = vmax.f32 %v1455_v46, 0.0  ;;  %v3071_v46 = vld [vmem:[#allocation23] sm:$0xff]   ;;  %v3075_v51 = vld [vmem:[#allocation23 + $0x10] sm:$0xff]  }
 0x626   :  { %v1454_v54 = vadd.f32 %v4031_v36, %v1386_v53  ;;  %v1469_v57 = vmax.f32 %v1453_v50, 0.0  ;;  %v3072_v50 = vld [vmem:[#allocation23 + $0x8] sm:$0xff]   ;;  %v3077_v53 = vld [vmem:[#allocation7 + $0x20] sm:$0xff]  }
 0x627   :  { %v1472_v56 = vmax.f32 %v1456_v52, 0.0  ;;  %v3074_v52 = vld [vmem:[#allocation7 + $0x18] sm:$0xff]  }
 0x628   :  { %v1470_v58 = vmax.f32 %v1454_v54, 0.0  ;;  %v3076_v54 = vld [vmem:[#allocation23 + $0x18] sm:$0xff]  }
 0x629   :  { %v1486_v59 = vpack.c.bf16 %v1472_v56, %v1471_v55  ;;  %v3079_v55 = vld [vmem:[#allocation23 + $0x20] sm:$0xff]  }
 0x62a   :  { %v1485_v60 = vpack.c.bf16 %v1470_v58, %v1469_v57  ;;  %v2796_v61 = vpop.f32.mrb[20].mxu1  ;;  %v3078_v56 = vld [vmem:[#allocation7 + $0x28] sm:$0xff]   ;;  %v3080_v57 = vld [vmem:[#allocation23 + $0x28] sm:$0xff]  }
 0x62b   :  { %v1459_v62 = vadd.f32 %v2796_v61, %v4031_v36  ;;  %v1399_v63 = vpop.f32.mrb[21].mxu1  ;;  %v3081_v58 = vld [vmem:[#allocation7 + $0x30] sm:$0xff]   ;;  %v3084_v61 = vld [vmem:[#allocation23 + $0x38] sm:$0xff]  }
 0x62c   :  { %v1457_v7 = vadd.f32 %v4031_v36, %v1399_v63  ;;  %v2797_v9 = vpop.f32.mrb[22].mxu1  ;;  %2822 = vmatprep.mubr.bf16.mxu0 %v1485_v60  ;;  %v3083_v60 = vld [vmem:[#allocation23 + $0x30] sm:$0xff]  }
 0x62d   :  { %v1460_v0 = vadd.f32 %v2797_v9, %v4031_v36  ;;  %v1402_v4 = vpop.f32.mrb[23].mxu1  ;;  %2823 = vmatmul.mubr.bf16.vlgmr.msra.gmra.mrb[48].mxu0 %v1486_v59  ;;  %v1475_v19 = vmax.f32 %v1459_v62, 0.0  ;;  %v3082_v59 = vld [vmem:[#allocation7 + $0x38] sm:$0xff]   ;;  %v3085_v62 = vld [vmem:[#allocation28] sm:$0xff]  }
 0x62e   :  { %v1458_v18 = vadd.f32 %v4031_v36, %v1402_v4  ;;  %2839 = vmatpush3.bf16.msra.mxu0 %v3061_v48  ;;  %v1473_v20 = vmax.f32 %v1457_v7, 0.0  ;;  %v3069_v48 = vld [vmem:[#allocation7] sm:$0xff]   ;;  %v3086_v63 = vld [vmem:[#allocation28 + $0x8] sm:$0xff]   ;;  %2902 = vmatprep.subr.bf16.mxu1 %v3085_v62  ;;  %v3089_v9 = vld [vmem:[#allocation28 + $0x20] sm:$0xff]  }
 0x62f   :  { %v1476_v16 = vmax.f32 %v1460_v0, 0.0  ;;  %2840 = vmatprep.subr.bf16.mxu0 %v3062_v6  ;;  %2903 = vmatpush3.bf16.msra.mxu1 %v3085_v62  ;;  %v3088_v7 = vld [vmem:[#allocation28 + $0x18] sm:$0xff]   ;;  %v3090_v0 = vld [vmem:[#allocation28 + $0x28] sm:$0xff]  }
 0x630   :  { %v1474_v22 = vmax.f32 %v1458_v18, 0.0  ;;  %2904 = vmatprep.subr.bf16.mxu1 %v3086_v63  ;;  %v2363_v18 = vld [vmem:[#allocation22] ss:$0 sm:$0xff] }
 0x631   :  { %v1488_v23 = vpack.c.bf16 %v1476_v16, %v1475_v19 }
 0x632   :  { %v1487_v24 = vpack.c.bf16 %v1474_v22, %v1473_v20  ;;  %v2800_v25 = vpop.f32.mrb[24].mxu1  ;;  %2841 = vmatpush3.bf16.msra.mxu0 %v3062_v6  ;;  %v3087_v6 = vld [vmem:[#allocation28 + $0x10] sm:$0xff]  }
 0x633   :  { %v1463_v26 = vadd.f32 %v2800_v25, %v4031_v36  ;;  %v1415_v1 = vpop.f32.mrb[25].mxu1  ;;  %2842 = vmatprep.subr.bf16.mxu0 %v3063_v21  ;;  %2905 = vmatpush3.bf16.msra.mxu1 %v3086_v63 }
 0x634   :  { %v1461_v2 = vadd.f32 %v4031_v36, %v1415_v1  ;;  %v2801_v15 = vpop.f32.mrb[26].mxu1  ;;  %2826 = vmatprep.mubr.bf16.mxu0 %v1487_v24  ;;  %2906 = vmatprep.subr.bf16.mxu1 %v3087_v6 }
 0x635   :  { %v1464_v3 = vadd.f32 %v2801_v15, %v4031_v36  ;;  %v1418_v17 = vpop.f32.mrb[27].mxu1  ;;  %2827 = vmatmul.mubr.bf16.gmra.mrb[52].mxu0 %v1488_v23  ;;  %v1479_v27 = vmax.f32 %v1463_v26, 0.0 }
 0x636   :  { %v1462_v8 = vadd.f32 %v4031_v36, %v1418_v17  ;;  %2843 = vmatpush3.bf16.msra.mxu0 %v3063_v21  ;;  %v1477_v28 = vmax.f32 %v1461_v2, 0.0 }
 0x637   :  { %v1480_v11 = vmax.f32 %v1464_v3, 0.0  ;;  %2844 = vmatprep.subr.bf16.mxu0 %v3064_v13  ;;  %2907 = vmatpush3.bf16.msra.mxu1 %v3087_v6 }
 0x638   :  { %v1478_v12 = vmax.f32 %v1462_v8, 0.0  ;;  %2908 = vmatprep.subr.bf16.mxu1 %v3088_v7 }
 0x639   :  { %v1490_v5 = vpack.c.bf16 %v1480_v11, %v1479_v27 }
 0x63a   :  { %v1489_v29 = vpack.c.bf16 %v1478_v12, %v1477_v28  ;;  %v2804_v14 = vpop.f32.mrb[28].mxu1  ;;  %2845 = vmatpush3.bf16.msra.mxu0 %v3064_v13 }
 0x63b   :  { %v1467_v30 = vadd.f32 %v2804_v14, %v4031_v36  ;;  %v1431_v31 = vpop.f32.mrb[29].mxu1  ;;  %2846 = vmatprep.subr.bf16.mxu0 %v3065_v10  ;;  %2909 = vmatpush3.bf16.msra.mxu1 %v3088_v7 }
 0x63c   :  { %v1465_v33 = vadd.f32 %v4031_v36, %v1431_v31  ;;  %v2805_v34 = vpop.f32.mrb[30].mxu1  ;;  %2830 = vmatprep.mubr.bf16.mxu0 %v1489_v29  ;;  %2910 = vmatprep.subr.bf16.mxu1 %v3089_v9 }
 0x63d   :  { %v1468_v35 = vadd.f32 %v2805_v34, %v4031_v36  ;;  %v1434_v38 = vpop.f32.mrb[31].mxu1  ;;  %2831 = vmatmul.mubr.bf16.gmra.mrb[56].mxu0 %v1490_v5  ;;  %v1483_v40 = vmax.f32 %v1467_v30, 0.0 }
 0x63e   :  { %v1466_v39 = vadd.f32 %v4031_v36, %v1434_v38  ;;  %2847 = vmatpush3.bf16.msra.mxu0 %v3065_v10  ;;  %v1481_v43 = vmax.f32 %v1465_v33, 0.0  ;;  %v3070_v36 = vld [vmem:[#allocation7 + $0x8] sm:$0xff]  }
 0x63f   :  { %v1484_v41 = vmax.f32 %v1468_v35, 0.0  ;;  %2848 = vmatprep.subr.bf16.mxu0 %v3066_v32  ;;  %2911 = vmatpush3.bf16.msra.mxu1 %v3089_v9 }
 0x640   :  { %v1482_v44 = vmax.f32 %v1466_v39, 0.0  ;;  %2912 = vmatprep.subr.bf16.mxu1 %v3090_v0 }
 0x641   :  { %v1492_v45 = vpack.c.bf16 %v1484_v41, %v1483_v40 }
 0x642   :  { %v1491_v37 = vpack.c.bf16 %v1482_v44, %v1481_v43  ;;  %2849 = vmatpush3.bf16.msra.mxu0 %v3066_v32 }
 0x643   :  { %2850 = vmatprep.subr.bf16.mxu0 %v3067_v42  ;;  %2913 = vmatpush3.bf16.msra.mxu1 %v3090_v0 }
 0x644   :  { %2834 = vmatprep.mubr.bf16.mxu0 %v1491_v37 }
 0x645   :  { %2835 = vmatmul.mubr.bf16.gmra.mrb[60].mxu0 %v1492_v45 }
 0x646   :  { %2851 = vmatpush3.bf16.msra.mxu0 %v3067_v42  ;;  %2854 = vmatprep.mubr.bf16.mxu0 %v3069_v48  ;;  %v3091_v48 = vld [vmem:[#allocation28 + $0x30] sm:$0xff]  }
 0x647   :  { %2852 = vmatprep.subr.bf16.mxu0 %v3068_v47  ;;  %2914 = vmatprep.subr.bf16.mxu1 %v3091_v48 }
 0x648   :  { %2915 = vmatpush3.bf16.msra.mxu1 %v3091_v48 }
 0x64a   :  { %2853 = vmatpush3.bf16.msra.mxu0 %v3068_v47  ;;  %v3092_v47 = vld [vmem:[#allocation28 + $0x38] sm:$0xff]  }
 0x64b   :  { %2870 = vmatprep.subr.bf16.mxu0 %v3071_v46  ;;  %2916 = vmatprep.subr.bf16.mxu1 %v3092_v47 }
 0x64c   :  { %2917 = vmatpush3.bf16.msra.mxu1 %v3092_v47 }
 0x64d   :  { %2855 = vmatmul.mubr.bf16.vlgmr.msra.gmra.mrb[64].mxu0 %v3070_v36 }
 0x64e   :  { %2871 = vmatpush3.bf16.msra.mxu0 %v3071_v46  ;;  %2858 = vmatprep.mubr.bf16.mxu0 %v3073_v49  ;;  %v2396_v46 = vld [vmem:[#allocation26] ss:$0 sm:$0xff] }
 0x64f   :  { %2872 = vmatprep.subr.bf16.mxu0 %v3072_v50 }
 0x652   :  { %2873 = vmatpush3.bf16.msra.mxu0 %v3072_v50 }
 0x653   :  { %2874 = vmatprep.subr.bf16.mxu0 %v3075_v51 }
 0x655   :  { %2859 = vmatmul.mubr.bf16.gmra.mrb[68].mxu0 %v3074_v52 }
 0x656   :  { %2875 = vmatpush3.bf16.msra.mxu0 %v3075_v51  ;;  %2862 = vmatprep.mubr.bf16.mxu0 %v3077_v53 }
 0x657   :  { %2876 = vmatprep.subr.bf16.mxu0 %v3076_v54 }
 0x65a   :  { %2877 = vmatpush3.bf16.msra.mxu0 %v3076_v54 }
 0x65b   :  { %2878 = vmatprep.subr.bf16.mxu0 %v3079_v55 }
 0x65d   :  { %2863 = vmatmul.mubr.bf16.gmra.mrb[72].mxu0 %v3078_v56 }
 0x65e   :  { %2879 = vmatpush3.bf16.msra.mxu0 %v3079_v55  ;;  %2866 = vmatprep.mubr.bf16.mxu0 %v3081_v58 }
 0x65f   :  { %2880 = vmatprep.subr.bf16.mxu0 %v3080_v57 }
 0x662   :  { %2881 = vmatpush3.bf16.msra.mxu0 %v3080_v57 }
 0x663   :  { %2882 = vmatprep.subr.bf16.mxu0 %v3083_v60 }
 0x665   :  { %2867 = vmatmul.mubr.bf16.gmra.mrb[76].mxu0 %v3082_v59 }
 0x666   :  { %2883 = vmatpush3.bf16.msra.mxu0 %v3083_v60 }
 0x667   :  { %2884 = vmatprep.subr.bf16.mxu0 %v3084_v61 }
 0x66a   :  { %2885 = vmatpush3.bf16.msra.mxu0 %v3084_v61 }
 0x700   :  { %v2824_v4 = vpop.f32.mrb[48].mxu0 }
 0x701   :  { %v1598_v19 = vpop.f32.mrb[49].mxu0  ;;  %v1607_v21 = vadd.f32 %v2824_v4, %v2363_v18 }
 0x702   :  { %v2825_v16 = vpop.f32.mrb[50].mxu0  ;;  %v1599_v23 = vadd.f32 %v2363_v18, %v1598_v19 }
 0x703   :  { %v1610_v20 = vadd.f32 %v2825_v16, %v2363_v18  ;;  %v1601_v22 = vpop.f32.mrb[51].mxu0 }
 0x704   :  { %v1602_v24 = vadd.f32 %v2363_v18, %v1601_v22 }
 0x705   :  { %v1662_v25 = vpack.c.bf16 %v1610_v20, %v1607_v21 }
 0x706   :  { %v1661_v26 = vpack.c.bf16 %v1602_v24, %v1599_v23 }
 0x708   :  { %v2828_v1 = vpop.f32.mrb[52].mxu0  ;;  %2886 = vmatprep.mubr.bf16.mxu0 %v1661_v26 }
 0x709   :  { %v1614_v13 = vpop.f32.mrb[53].mxu0  ;;  %2887 = vmatmul.mubr.bf16.vlgmr.msra.gmra.mrb[64].mxu0 %v1662_v25  ;;  %v1623_v15 = vadd.f32 %v2828_v1, %v2363_v18 }
 0x70a   :  { %v2829_v2 = vpop.f32.mrb[54].mxu0  ;;  %v1615_v8 = vadd.f32 %v2363_v18, %v1614_v13 }
 0x70b   :  { %v1626_v3 = vadd.f32 %v2829_v2, %v2363_v18  ;;  %v1617_v17 = vpop.f32.mrb[55].mxu0 }
 0x70c   :  { %v1618_v27 = vadd.f32 %v2363_v18, %v1617_v17 }
 0x70d   :  { %v1664_v11 = vpack.c.bf16 %v1626_v3, %v1623_v15 }
 0x70e   :  { %v1663_v10 = vpack.c.bf16 %v1618_v27, %v1615_v8 }
 0x710   :  { %v2832_v28 = vpop.f32.mrb[56].mxu0  ;;  %2890 = vmatprep.mubr.bf16.mxu0 %v1663_v10 }
 0x711   :  { %v1630_v12 = vpop.f32.mrb[57].mxu0  ;;  %2891 = vmatmul.mubr.bf16.gmra.mrb[68].mxu0 %v1664_v11  ;;  %v1639_v29 = vadd.f32 %v2832_v28, %v2363_v18 }
 0x712   :  { %v2833_v5 = vpop.f32.mrb[58].mxu0  ;;  %v1631_v31 = vadd.f32 %v2363_v18, %v1630_v12 }
 0x713   :  { %v1642_v14 = vadd.f32 %v2833_v5, %v2363_v18  ;;  %v1633_v30 = vpop.f32.mrb[59].mxu0 }
 0x714   :  { %v1634_v32 = vadd.f32 %v2363_v18, %v1633_v30 }
 0x715   :  { %v1666_v33 = vpack.c.bf16 %v1642_v14, %v1639_v29 }
 0x716   :  { %v1665_v34 = vpack.c.bf16 %v1634_v32, %v1631_v31 }
 0x718   :  { %v2836_v35 = vpop.f32.mrb[60].mxu0  ;;  %2894 = vmatprep.mubr.bf16.mxu0 %v1665_v34 }
 0x719   :  { %v1646_v38 = vpop.f32.mrb[61].mxu0  ;;  %2895 = vmatmul.mubr.bf16.gmra.mrb[72].mxu0 %v1666_v33  ;;  %v1655_v40 = vadd.f32 %v2836_v35, %v2363_v18 }
 0x71a   :  { %v2837_v39 = vpop.f32.mrb[62].mxu0  ;;  %v1647_v43 = vadd.f32 %v2363_v18, %v1646_v38 }
 0x71b   :  { %v1658_v41 = vadd.f32 %v2837_v39, %v2363_v18  ;;  %v1649_v42 = vpop.f32.mrb[63].mxu0 }
 0x71c   :  { %v1650_v44 = vadd.f32 %v2363_v18, %v1649_v42  ;;  %v2397_v42 = vld [vmem:[#allocation29] ss:$0 sm:$0xff] }
 0x71d   :  { %v1668_v45 = vpack.c.bf16 %v1658_v41, %v1655_v40 }
 0x71e   :  { %v1667_v37 = vpack.c.bf16 %v1650_v44, %v1647_v43 }
 0x720   :  { %2898 = vmatprep.mubr.bf16.mxu0 %v1667_v37 }
 0x721   :  { %2899 = vmatmul.mubr.bf16.gmra.mrb[76].mxu0 %v1668_v45 }
 0x7dc   :  { %v2888_v36 = vpop.f32.mrb[64].mxu0 }
 0x7dd   :  { %v2064_v49 = vadd.f32 %v2888_v36, %v2396_v46  ;;  %v1992_v50 = vpop.f32.mrb[65].mxu0 }
 0x7de   :  { %v2062_v51 = vadd.f32 %v2396_v46, %v1992_v50  ;;  %v2889_v52 = vpop.f32.mrb[66].mxu0 }
 0x7df   :  { %v2065_v53 = vadd.f32 %v2889_v52, %v2396_v46  ;;  %v1995_v54 = vpop.f32.mrb[67].mxu0  ;;  %v2080_v56 = vmax.f32 %v2064_v49, 0.0 }
 0x7e0   :  { %v2063_v55 = vadd.f32 %v2396_v46, %v1995_v54  ;;  %v2078_v58 = vmax.f32 %v2062_v51, 0.0 }
 0x7e1   :  { %v2081_v57 = vmax.f32 %v2065_v53, 0.0 }
 0x7e2   :  { %v2079_v59 = vmax.f32 %v2063_v55, 0.0 }
 0x7e3   :  { %v2095_v60 = vpack.c.bf16 %v2081_v57, %v2080_v56 }
 0x7e4   :  { %v2094_v61 = vpack.c.bf16 %v2079_v59, %v2078_v58  ;;  %v2892_v62 = vpop.f32.mrb[68].mxu0 }
 0x7e5   :  { %v2068_v63 = vadd.f32 %v2892_v62, %v2396_v46  ;;  %v2008_v6 = vpop.f32.mrb[69].mxu0 }
 0x7e6   :  { %v2066_v7 = vadd.f32 %v2396_v46, %v2008_v6  ;;  %v2893_v9 = vpop.f32.mrb[70].mxu0  ;;  %2918 = vmatprep.mubr.bf16.mxu1 %v2094_v61 }
 0x7e7   :  { %v2069_v0 = vadd.f32 %v2893_v9, %v2396_v46  ;;  %v2011_v4 = vpop.f32.mrb[71].mxu0  ;;  %2919 = vmatmul.mubr.bf16.vlgmr.msra.gmra.mrb[32].mxu1 %v2095_v60  ;;  %v2084_v19 = vmax.f32 %v2068_v63, 0.0 }
 0x7e8   :  { %v2067_v18 = vadd.f32 %v2396_v46, %v2011_v4  ;;  %v2082_v21 = vmax.f32 %v2066_v7, 0.0 }
 0x7e9   :  { %v2085_v16 = vmax.f32 %v2069_v0, 0.0 }
 0x7ea   :  { %v2083_v20 = vmax.f32 %v2067_v18, 0.0 }
 0x7eb   :  { %v2097_v22 = vpack.c.bf16 %v2085_v16, %v2084_v19 }
 0x7ec   :  { %v2096_v23 = vpack.c.bf16 %v2083_v20, %v2082_v21  ;;  %v2896_v24 = vpop.f32.mrb[72].mxu0 }
 0x7ed   :  { %v2072_v25 = vadd.f32 %v2896_v24, %v2396_v46  ;;  %v2024_v26 = vpop.f32.mrb[73].mxu0 }
 0x7ee   :  { %v2070_v1 = vadd.f32 %v2396_v46, %v2024_v26  ;;  %v2897_v13 = vpop.f32.mrb[74].mxu0  ;;  %2922 = vmatprep.mubr.bf16.mxu1 %v2096_v23 }
 0x7ef   :  { %v2073_v2 = vadd.f32 %v2897_v13, %v2396_v46  ;;  %v2027_v15 = vpop.f32.mrb[75].mxu0  ;;  %2923 = vmatmul.mubr.bf16.gmra.mrb[36].mxu1 %v2097_v22  ;;  %v2088_v17 = vmax.f32 %v2072_v25, 0.0 }
 0x7f0   :  { %v2071_v3 = vadd.f32 %v2396_v46, %v2027_v15  ;;  %v2086_v27 = vmax.f32 %v2070_v1, 0.0 }
 0x7f1   :  { %v2089_v8 = vmax.f32 %v2073_v2, 0.0 }
 0x7f2   :  { %v2087_v11 = vmax.f32 %v2071_v3, 0.0 }
 0x7f3   :  { %v2099_v10 = vpack.c.bf16 %v2089_v8, %v2088_v17 }
 0x7f4   :  { %v2098_v28 = vpack.c.bf16 %v2087_v11, %v2086_v27  ;;  %v2900_v12 = vpop.f32.mrb[76].mxu0 }
 0x7f5   :  { %v2076_v5 = vadd.f32 %v2900_v12, %v2396_v46  ;;  %v2040_v29 = vpop.f32.mrb[77].mxu0 }
 0x7f6   :  { %v2074_v14 = vadd.f32 %v2396_v46, %v2040_v29  ;;  %v2901_v30 = vpop.f32.mrb[78].mxu0  ;;  %2926 = vmatprep.mubr.bf16.mxu1 %v2098_v28 }
 0x7f7   :  { %v2077_v31 = vadd.f32 %v2901_v30, %v2396_v46  ;;  %v2043_v32 = vpop.f32.mrb[79].mxu0  ;;  %2927 = vmatmul.mubr.bf16.gmra.mrb[40].mxu1 %v2099_v10  ;;  %v2092_v34 = vmax.f32 %v2076_v5, 0.0 }
 0x7f8   :  { %v2075_v33 = vadd.f32 %v2396_v46, %v2043_v32  ;;  %v2090_v38 = vmax.f32 %v2074_v14, 0.0 }
 0x7f9   :  { %v2093_v35 = vmax.f32 %v2077_v31, 0.0 }
 0x7fa   :  { %v2091_v39 = vmax.f32 %v2075_v33, 0.0 }
 0x7fb   :  { %v2101_v40 = vpack.c.bf16 %v2093_v35, %v2092_v34 }
 0x7fc   :  { %v2100_v41 = vpack.c.bf16 %v2091_v39, %v2090_v38 }
 0x7fe   :  { %2930 = vmatprep.mubr.bf16.mxu1 %v2100_v41 }
 0x7ff   :  { %2931 = vmatmul.mubr.bf16.gmra.mrb[44].mxu1 %v2101_v40 }
 0x8ba   :  { %v2920_v43 = vpop.f32.mrb[32].mxu1 }
 0x8bb   :  { %v2216_v44 = vadd.f32 %v2920_v43, %v2397_v42  ;;  %v2207_v45 = vpop.f32.mrb[33].mxu1 }
 0x8bc   :  { %v2208_v37 = vadd.f32 %v2397_v42, %v2207_v45  ;;  %v2921_v48 = vpop.f32.mrb[34].mxu1 }
 0x8bd   :  { %2272 = vst [vmem:[#allocation31 + $0x10] sm:$0xff] %v2216_v44  ;;  %v2219_v47 = vadd.f32 %v2921_v48, %v2397_v42  ;;  %v2210_v36 = vpop.f32.mrb[35].mxu1 }
 0x8be   :  { %2270 = vst [vmem:[#allocation31] sm:$0xff] %v2208_v37  ;;  %v2211_v49 = vadd.f32 %v2397_v42, %v2210_v36 }
 0x8bf   :  { %2273 = vst [vmem:[#allocation31 + $0x18] sm:$0xff] %v2219_v47 }
 0x8c0   :  { %2271 = vst [vmem:[#allocation31 + $0x8] sm:$0xff] %v2211_v49 }
 0x8c2   :  { %v2924_v46 = vpop.f32.mrb[36].mxu1 }
 0x8c3   :  { %v2232_v50 = vadd.f32 %v2924_v46, %v2397_v42  ;;  %v2223_v51 = vpop.f32.mrb[37].mxu1 }
 0x8c4   :  { %v2224_v52 = vadd.f32 %v2397_v42, %v2223_v51  ;;  %v2925_v53 = vpop.f32.mrb[38].mxu1 }
 0x8c5   :  { %2276 = vst [vmem:[#allocation31 + $0x30] sm:$0xff] %v2232_v50  ;;  %v2235_v54 = vadd.f32 %v2925_v53, %v2397_v42  ;;  %v2226_v55 = vpop.f32.mrb[39].mxu1 }
 0x8c6   :  { %2274 = vst [vmem:[#allocation31 + $0x20] sm:$0xff] %v2224_v52  ;;  %v2227_v56 = vadd.f32 %v2397_v42, %v2226_v55 }
 0x8c7   :  { %2277 = vst [vmem:[#allocation31 + $0x38] sm:$0xff] %v2235_v54 }
 0x8c8   :  { %2275 = vst [vmem:[#allocation31 + $0x28] sm:$0xff] %v2227_v56 }
 0x8ca   :  { %v2928_v57 = vpop.f32.mrb[40].mxu1 }
 0x8cb   :  { %v2248_v58 = vadd.f32 %v2928_v57, %v2397_v42  ;;  %v2239_v59 = vpop.f32.mrb[41].mxu1 }
 0x8cc   :  { %v2240_v60 = vadd.f32 %v2397_v42, %v2239_v59  ;;  %v2929_v61 = vpop.f32.mrb[42].mxu1 }
 0x8cd   :  { %2280 = vst [vmem:[#allocation31 + $0x50] sm:$0xff] %v2248_v58  ;;  %v2251_v62 = vadd.f32 %v2929_v61, %v2397_v42  ;;  %v2242_v63 = vpop.f32.mrb[43].mxu1 }
 0x8ce   :  { %2278 = vst [vmem:[#allocation31 + $0x40] sm:$0xff] %v2240_v60  ;;  %v2243_v6 = vadd.f32 %v2397_v42, %v2242_v63 }
 0x8cf   :  { %2281 = vst [vmem:[#allocation31 + $0x58] sm:$0xff] %v2251_v62 }
 0x8d0   :  { %2279 = vst [vmem:[#allocation31 + $0x48] sm:$0xff] %v2243_v6 }
 0x8d2   :  { %v2932_v7 = vpop.f32.mrb[44].mxu1 }
 0x8d3   :  { %v2264_v9 = vadd.f32 %v2932_v7, %v2397_v42  ;;  %v2255_v0 = vpop.f32.mrb[45].mxu1 }
 0x8d4   :  { %v2256_v4 = vadd.f32 %v2397_v42, %v2255_v0  ;;  %v2933_v18 = vpop.f32.mrb[46].mxu1 }
 0x8d5   :  { %2284 = vst [vmem:[#allocation31 + $0x70] sm:$0xff] %v2264_v9  ;;  %v2267_v19 = vadd.f32 %v2933_v18, %v2397_v42  ;;  %v2258_v16 = vpop.f32.mrb[47].mxu1 }
 0x8d6   :  { %2282 = vst [vmem:[#allocation31 + $0x60] sm:$0xff] %v2256_v4  ;;  %v2259_v21 = vadd.f32 %v2397_v42, %v2258_v16 }
 0x8d7   :  { %2285 = vst [vmem:[#allocation31 + $0x78] sm:$0xff] %v2267_v19 }
 0x8d8   :  { %2283 = vst [vmem:[#allocation31 + $0x68] sm:$0xff] %v2259_v21 }
 0x8d9   :  { %3500 = shalt.err (!%p3497_p8)
}
 0x8da   :  { %s4097_s25 = sld [smem:[#allocation47_spill]] }
 0x8e0   :  { %s3501_s17 = scalar_lea.hbm %s4097_s25, 2048 }
 0x8e1   :  { %p3502_p9 = scmp.ne.s32.totalorder %s4097_s25, %s3501_s17  ;;  %p3505_p10 = scmp.lt.u32.totalorder %s3501_s17, %s4097_s25 }
 0x8e3   :  { %p3507_p11 = pnand %p3505_p10, %p3502_p9 }
 0x8e5   :  { %3510 = shalt.err (!%p3507_p11)
}
 0x8e6   :  { %2297 = dma.vmem_to_hbm [thread:$0]  %s2292_s0, 2048, %s4097_s25, [#allocation4], %s3544_s15, %s3544_s15, %s3545_s22  }
 0x8e7   :  { %3531 = dma.done.wait [#allocation4], 2048  }
 0x8e8   :  { %3532 = vsyncadd [#allocation4], 4294965248 }
 0x8e9   :  { %2301 = vsyncpa [#allocation3], 1 }
 0x8ea   :  { %2302 = vsyncpa [#allocation6], 1 }
 0x8eb   :  { %2303 = vsyncpa [#allocation9], 1 }
 0x8ec   :  { %2304 = vsyncpa [#allocation12], 1 }
 0x8ed   :  { %2305 = vsyncpa [#allocation15], 1 }
 0x8ee   :  { %2306 = vsyncpa [#allocation18], 1 }
 0x8ef   :  { %2307 = vsyncpa [#allocation21], 1 }
 0x8f0   :  { %2308 = vsyncpa [#allocation24], 1 }
 0x8f1   :  { %2309 = vsyncpa [#allocation27], 1 }
 0x8f2   :  { %2310 = vsyncpa [#allocation30], 1 }
 0x8f3   :  { %2311 = vsyncpa [#allocation4], 1 }

</bundles_post_ra>
